<compile_context>
chip_gen: v5e
topology: v5e:2x2
jax: 0.10.0
libtpu: 0.0.40
codegen_flags: <defaults>
</compile_context>

<pallas_src>
import functools

import jax
import jax.numpy as jnp
from jax.experimental import pallas as pl
from jax.experimental.pallas import tpu as pltpu

EPS_LN = 1e-6
EPS_GRN = 1e-6
LANE = 128


def _round_up(n, m):
    return ((n + m - 1) // m) * m


def _ln_padded(v, w, b, n_true):
    # LayerNorm over channels (lanes).  `v` may be zero-padded along channels;
    # two-pass variance with an exact correction for the zero padded lanes
    # (each padded lane contributes (0 - mu)^2 to the raw sum of squares).
    n_pad = v.shape[-1] - n_true
    inv_n = 1.0 / n_true
    mu = jnp.sum(v, axis=-1, keepdims=True) * inv_n
    d = v - mu
    ss = jnp.sum(d * d, axis=-1, keepdims=True)
    if n_pad:
        ss = ss - n_pad * (mu * mu)
    var = ss * inv_n
    return d * jax.lax.rsqrt(var + EPS_LN) * w + b


def _grn_padded(v, g, b, n_true, row_mask=None):
    # GRN: L2 norm over time per channel, normalized by its mean over true channels.
    # `row_mask` (if given) excludes padded time rows from the statistics.
    vs = v if row_mask is None else jnp.where(row_mask, v, 0.0)
    gx = jnp.sqrt(jnp.sum(vs * vs, axis=0, keepdims=True))              # (1, C)
    denom = jnp.sum(gx, axis=-1, keepdims=True) * (1.0 / n_true) + EPS_GRN
    nx = gx / denom
    return g * (v * nx) + b + v


def u2c_kernel(units_ref, spkp_ref,
               conv_w_ref, conv_b_ref, ln1_w_ref, ln1_b_ref,
               grn1_g_ref, grn1_b_ref,
               dw_w_ref, dw_b_ref, ln2_w_ref, ln2_b_ref,
               pw1_w_ref, pw1_b_ref, grn2_g_ref, grn2_b_ref,
               pw2_w_ref, pw2_b_ref, out_w_ref, out_b_ref,
               o_ref, h_ext_ref, *, t_true, m_true, c2_true, k_dw):
    t_p = o_ref.shape[1]
    cin_p = units_ref.shape[2]
    m_p = conv_b_ref.shape[1]
    c2_p = grn2_g_ref.shape[1]
    t_pad = t_p != t_true                       # static python bool
    half_k = k_dw // 2

    # ---- stack[0]: Conv1d(Cin->M, k=3, pad=1) as 3 accumulating MXU matmuls ----
    # units are pre-haloed by the wrapper: zero rows [0, 8), data rows [8, 8+T),
    # zeros after.  Upcast to f32 before the sublane-unaligned tap slices, then
    # feed bf16 operands to the MXU (f32 accumulation).  Exact round-trip: the
    # data originated as bf16.
    xf = units_ref[0].astype(jnp.float32)                               # (T_ext, Cin_p)
    y = jnp.dot(xf[7:7 + t_p].astype(jnp.bfloat16), conv_w_ref[0:cin_p, :],
                preferred_element_type=jnp.float32)
    y += jnp.dot(xf[8:8 + t_p].astype(jnp.bfloat16), conv_w_ref[cin_p:2 * cin_p, :],
                 preferred_element_type=jnp.float32)
    y += jnp.dot(xf[9:9 + t_p].astype(jnp.bfloat16), conv_w_ref[2 * cin_p:3 * cin_p, :],
                 preferred_element_type=jnp.float32)
    y = y + conv_b_ref[...]                                             # (T_p, M_p)

    row_mask_m = None
    row_mask_c2 = None
    if t_pad:
        row_mask_m = jax.lax.broadcasted_iota(jnp.int32, (t_p, m_p), 0) < t_true
        row_mask_c2 = jax.lax.broadcasted_iota(jnp.int32, (t_p, c2_p), 0) < t_true

    # ---- stack[1]: LayerNorm -> CELU -> GRN (channels-last) ----
    y = _ln_padded(y, ln1_w_ref[...], ln1_b_ref[...], m_true)
    y = jnp.where(y > 0, y, jnp.exp(jnp.minimum(y, 0.0)) - 1.0)         # CELU(alpha=1)
    y = _grn_padded(y, grn1_g_ref[...], grn1_b_ref[...], m_true, row_mask_m)

    # ---- + speaker-embedding projection (precomputed in the wrapper) ----
    h = y + spkp_ref[0]                                                 # (1, M_p) bcast

    # ---- recon[0]: ConvNeXtV2-GLU block (dwconv7 -> LN -> GLU -> GRN -> pw2 -> +res) ----
    residual = h

    # Depthwise conv via a zero-haloed VMEM scratch: h at rows [8, 8+T_p), taps are
    # plain (possibly unaligned-read) slices -- no rolls, no iota masks.
    zeros8 = jnp.zeros((8, m_p), jnp.float32)
    h_ext_ref[0:8, :] = zeros8
    h_ext_ref[t_p + 8:t_p + 16, :] = zeros8
    h_ext_ref[8:8 + t_p, :] = h if not t_pad else jnp.where(row_mask_m, h, 0.0)

    dw = dw_w_ref[...]                                                  # (8, M_p) loaded once
    acc = h_ext_ref[8 - half_k:8 - half_k + t_p, :] * dw[0:1, :]
    for kk in range(1, k_dw):                                           # static unroll
        off = 8 - half_k + kk
        acc += h_ext_ref[off:off + t_p, :] * dw[kk:kk + 1, :]
    v = acc + dw_b_ref[...]
    v = _ln_padded(v, ln2_w_ref[...], ln2_b_ref[...], m_true)

    # Fused GLU projection: ONE (M_p, 2*C2_p) matmul, lane-aligned value/gate split.
    pw = jnp.dot(v.astype(jnp.bfloat16), pw1_w_ref[...],
                 preferred_element_type=jnp.float32) + pw1_b_ref[...]
    gl = pw[:, :c2_p] * jax.nn.sigmoid(pw[:, c2_p:])                    # (T_p, C2_p)
    gl = _grn_padded(gl, grn2_g_ref[...], grn2_b_ref[...], c2_true, row_mask_c2)
    v2 = jnp.dot(gl.astype(jnp.bfloat16), pw2_w_ref[...],
                 preferred_element_type=jnp.float32) + pw2_b_ref[...]
    h = residual + v2

    # ---- recon[1]: Linear(M -> n_hidden_channels) ----
    out = jnp.dot(h.astype(jnp.bfloat16), out_w_ref[...],
                  preferred_element_type=jnp.float32) + out_b_ref[...]
    o_ref[0] = out.astype(o_ref.dtype)


_W_ORDER = ["conv_w", "conv_b", "ln1_w", "ln1_b", "grn1_g", "grn1_b",
            "dw_w", "dw_b", "ln2_w", "ln2_b",
            "pw1_w", "pw1_b", "grn2_g", "grn2_b",
            "pw2_w", "pw2_b", "out_w", "out_b"]


def _pad2(a, rows, cols):
    return jnp.pad(a, ((0, rows - a.shape[0]), (0, cols - a.shape[1])))


def _prepare_weights(p, cin):
    """Pad channel dims to 128-lane multiples, fold the 3-tap conv into one
    (3*Cin_p, M_p) matrix, fuse the GLU projection, cast matmul weights to bf16."""
    m = p["conv_b"].shape[1]
    c2 = p["grn2_g"].shape[1]                 # M * dilation
    h = p["out_b"].shape[1]
    k_dw = p["dw_w"].shape[0]
    cin_p = _round_up(cin, LANE)
    m_p = _round_up(m, LANE)
    c2_p = _round_up(c2, LANE)
    h_p = _round_up(h, LANE)

    w = {}
    cw = jnp.pad(p["conv_w"], ((0, 0), (0, cin_p - cin), (0, m_p - m)))
    w["conv_w"] = cw.reshape(3 * cin_p, m_p).astype(jnp.bfloat16)
    w["conv_b"] = _pad2(p["conv_b"], 1, m_p)
    w["ln1_w"] = _pad2(p["ln1_w"], 1, m_p)
    w["ln1_b"] = _pad2(p["ln1_b"], 1, m_p)
    w["grn1_g"] = _pad2(p["grn1_g"], 1, m_p)
    w["grn1_b"] = _pad2(p["grn1_b"], 1, m_p)
    w["dw_w"] = _pad2(p["dw_w"].reshape(k_dw, m), _round_up(k_dw, 8), m_p)
    w["dw_b"] = _pad2(p["dw_b"], 1, m_p)
    w["ln2_w"] = _pad2(p["ln2_w"], 1, m_p)
    w["ln2_b"] = _pad2(p["ln2_b"], 1, m_p)
    # Fused GLU projection: value half at lanes [0, c2_p), gate half at [c2_p, 2*c2_p).
    pw1 = jnp.zeros((m_p, 2 * c2_p), jnp.float32)
    pw1 = pw1.at[:m, :c2].set(p["pw1_w"][:, :c2])
    pw1 = pw1.at[:m, c2_p:c2_p + c2].set(p["pw1_w"][:, c2:])
    w["pw1_w"] = pw1.astype(jnp.bfloat16)
    pw1b = jnp.zeros((1, 2 * c2_p), jnp.float32)
    pw1b = pw1b.at[:, :c2].set(p["pw1_b"][:, :c2])
    pw1b = pw1b.at[:, c2_p:c2_p + c2].set(p["pw1_b"][:, c2:])
    w["pw1_b"] = pw1b
    w["grn2_g"] = _pad2(p["grn2_g"], 1, c2_p)
    w["grn2_b"] = _pad2(p["grn2_b"], 1, c2_p)
    w["pw2_w"] = _pad2(p["pw2_w"], c2_p, m_p).astype(jnp.bfloat16)
    w["pw2_b"] = _pad2(p["pw2_b"], 1, m_p)
    w["out_w"] = _pad2(p["out_w"], m_p, h_p).astype(jnp.bfloat16)
    w["out_b"] = _pad2(p["out_b"], 1, h_p)
    dims = dict(m=m, c2=c2, h=h, k_dw=k_dw,
                cin_p=cin_p, m_p=m_p, c2_p=c2_p, h_p=h_p)
    return w, dims


def _vmem_limit_bytes():
    # Generation-aware scoped-VMEM limit: ~56 MiB on v7x (64 MiB parts),
    # ~100 MiB on v5e/v6e (128 MiB parts).
    try:
        cap = int(pltpu.get_tpu_info().vmem_capacity_bytes)
    except Exception:
        cap = 128 * 1024 * 1024
    return int(min(cap - 8 * 1024 * 1024, 100 * 1024 * 1024))


def _const_index_map(ndim):
    def index_map(b):
        return (0,) * ndim
    return index_map


def unit2control_forward(units, spk, params):
    B, T, Cin = units.shape
    w, d = _prepare_weights(params, Cin)
    cin_p, m_p, h_p = d["cin_p"], d["m_p"], d["h_p"]
    t_p = _round_up(T, 8)
    t_ext = t_p + 16            # +/-1 conv halo, kept sublane-aligned

    # bf16 input DMA, pre-haloed along time: zero rows [0, 8), data [8, 8+T), zeros after.
    units_ext = jnp.zeros((B, t_ext, cin_p), jnp.bfloat16)
    units_ext = units_ext.at[:, 8:8 + T, :Cin].set(units.astype(jnp.bfloat16))

    # Speaker-embedding Linear hoisted out of the kernel: one (B,S)x(S,M) XLA matmul.
    spk_proj = jnp.einsum("bos,sm->bom", spk, params["spk_w"]) + params["spk_b"]
    spk_proj = jnp.pad(spk_proj,
                       ((0, 0), (0, 0), (0, m_p - spk_proj.shape[-1]))).astype(jnp.float32)

    weights = [w[k] for k in _W_ORDER]
    in_specs = ([pl.BlockSpec((1, t_ext, cin_p), lambda b: (b, 0, 0)),
                 pl.BlockSpec((1, 1, m_p), lambda b: (b, 0, 0))]
                + [pl.BlockSpec(x.shape, _const_index_map(x.ndim)) for x in weights])

    kernel = functools.partial(u2c_kernel, t_true=T, m_true=d["m"],
                               c2_true=d["c2"], k_dw=d["k_dw"])

    out_p = pl.pallas_call(
        kernel,
        out_shape=jax.ShapeDtypeStruct((B, t_p, h_p), jnp.float32),
        grid=(B,),
        in_specs=in_specs,
        out_specs=pl.BlockSpec((1, t_p, h_p), lambda b: (b, 0, 0)),
        scratch_shapes=[pltpu.VMEM((t_p + 16, m_p), jnp.float32)],
        compiler_params=pltpu.CompilerParams(
            dimension_semantics=("parallel",),
            vmem_limit_bytes=_vmem_limit_bytes(),
        ),
    )(units_ext, spk_proj, *weights)
    # TODO(synk): downstream consumers could take the padded (T_p, H_p) slab directly
    # (or bf16) and skip this extra HBM copy.
    return out_p[:, :T, :d["h"]]


# ------------------------- plain-JAX reference (for checking) -------------------------
def _mm(a, w):
    # Matches the kernel's bf16-operand / f32-accumulate matmuls.
    return jnp.einsum("btc,cm->btm", a.astype(jnp.bfloat16), w.astype(jnp.bfloat16),
                      preferred_element_type=jnp.float32)


def reference_forward(units, spk, p):
    def ln(v, w, b):
        mu = v.mean(-1, keepdims=True)
        var = ((v - mu) ** 2).mean(-1, keepdims=True)
        return (v - mu) * jax.lax.rsqrt(var + EPS_LN) * w + b

    def grn(v, g, b):  # v: (B, T, C)
        gx = jnp.sqrt(jnp.sum(v * v, axis=1, keepdims=True))
        nx = gx / (jnp.mean(gx, axis=-1, keepdims=True) + EPS_GRN)
        return g * (v * nx) + b + v

    x = units.astype(jnp.float32)
    B, T, Cin = x.shape
    xm1 = jnp.pad(x, ((0, 0), (1, 0), (0, 0)))[:, :T]
    xp1 = jnp.pad(x, ((0, 0), (0, 1), (0, 0)))[:, 1:]
    y = (_mm(xm1, p["conv_w"][0]) + _mm(x, p["conv_w"][1]) + _mm(xp1, p["conv_w"][2])
         + p["conv_b"])
    y = ln(y, p["ln1_w"], p["ln1_b"])
    y = jnp.where(y > 0, y, jnp.exp(jnp.minimum(y, 0.0)) - 1.0)
    y = grn(y, p["grn1_g"], p["grn1_b"])
    spk_proj = jnp.einsum("bos,sm->bom", spk, p["spk_w"]) + p["spk_b"]
    h = y + spk_proj
    res = h
    K = p["dw_w"].shape[0]
    acc = jnp.zeros_like(h)
    for k in range(K):
        dt = k - K // 2
        if dt < 0:
            sh = jnp.pad(h, ((0, 0), (-dt, 0), (0, 0)))[:, :T]
        elif dt > 0:
            sh = jnp.pad(h, ((0, 0), (0, dt), (0, 0)))[:, dt:]
        else:
            sh = h
        acc = acc + sh * p["dw_w"][k]
    v = acc + p["dw_b"]
    v = ln(v, p["ln2_w"], p["ln2_b"])
    half = p["pw1_w"].shape[1] // 2
    val = _mm(v, p["pw1_w"][:, :half]) + p["pw1_b"][:, :half]
    gate = _mm(v, p["pw1_w"][:, half:]) + p["pw1_b"][:, half:]
    v = val * jax.nn.sigmoid(gate)
    v = grn(v, p["grn2_g"], p["grn2_b"])
    v = _mm(v, p["pw2_w"]) + p["pw2_b"]
    h = res + v
    return _mm(h, p["out_w"]) + p["out_b"]


def make_params(key, cin, s, m, h, k_dw=7, dilation=2):
    ks = jax.random.split(key, 16)
    f32 = jnp.float32
    p = {}
    p["conv_w"] = jax.random.normal(ks[0], (3, cin, m), f32) * (2.0 / (3 * cin)) ** 0.5
    p["conv_b"] = jax.random.normal(ks[1], (1, m), f32) * 0.02
    p["ln1_w"] = jnp.ones((1, m), f32)
    p["ln1_b"] = jnp.zeros((1, m), f32)
    p["grn1_g"] = jax.random.normal(ks[2], (1, m), f32) * 0.1
    p["grn1_b"] = jax.random.normal(ks[3], (1, m), f32) * 0.1
    p["spk_w"] = jax.random.normal(ks[4], (s, m), f32) * (1.0 / s) ** 0.5
    p["spk_b"] = jax.random.normal(ks[5], (1, m), f32) * 0.02
    p["dw_w"] = jax.random.normal(ks[6], (k_dw, 1, m), f32) * (1.0 / k_dw) ** 0.5
    p["dw_b"] = jax.random.normal(ks[7], (1, m), f32) * 0.02
    p["ln2_w"] = jnp.ones((1, m), f32)
    p["ln2_b"] = jnp.zeros((1, m), f32)
    p["pw1_w"] = jax.random.normal(ks[8], (m, m * dilation * 2), f32) * (1.0 / m) ** 0.5
    p["pw1_b"] = jax.random.normal(ks[9], (1, m * dilation * 2), f32) * 0.02
    p["grn2_g"] = jax.random.normal(ks[10], (1, m * dilation), f32) * 0.1
    p["grn2_b"] = jax.random.normal(ks[11], (1, m * dilation), f32) * 0.1
    p["pw2_w"] = jax.random.normal(ks[12], (m * dilation, m), f32) * (1.0 / (m * dilation)) ** 0.5
    p["pw2_b"] = jax.random.normal(ks[13], (1, m), f32) * 0.02
    p["out_w"] = jax.random.normal(ks[14], (m, h), f32) * (1.0 / m) ** 0.5
    p["out_b"] = jax.random.normal(ks[15], (1, h), f32) * 0.02
    return p


if __name__ == "__main__":
    key = jax.random.PRNGKey(0)
    # B, T, input_channel, spk_embed_channels, conv_stack_middle_size, n_hidden_channels
    B, T, Cin, S, M, H = 2, 16, 8, 16, 32, 64
    k1, k2, k3 = jax.random.split(key, 3)
    units = jax.random.normal(k1, (B, T, Cin), jnp.float32)  # module's `units` (pre .transpose(2,1))
    spk = jax.random.normal(k2, (B, 1, S), jnp.float32)      # speaker embedding (use_spk_embed=True)
    params = make_params(k3, Cin, S, M, H)

    out = unit2control_forward(units, spk, params)
    out = jax.block_until_ready(out)

    ref = reference_forward(units, spk, params)
    err = float(jnp.max(jnp.abs(out - ref)))
    assert out.shape == (B, T, H), out.shape
    assert err < 2e-2, f"max abs error {err}"
    print("KERNEL_OK")
</pallas_src>

<mosaic_0001>
module attributes {stable_mosaic.version = 11 : i64} {
  func.func @u2c_kernel(%arg0: i32, %arg1: memref<1x32x128xbf16, #tpu.memory_space<vmem>>, %arg2: memref<1x1x128xf32, #tpu.memory_space<vmem>>, %arg3: memref<384x128xbf16, #tpu.memory_space<vmem>>, %arg4: memref<1x128xf32, #tpu.memory_space<vmem>>, %arg5: memref<1x128xf32, #tpu.memory_space<vmem>>, %arg6: memref<1x128xf32, #tpu.memory_space<vmem>>, %arg7: memref<1x128xf32, #tpu.memory_space<vmem>>, %arg8: memref<1x128xf32, #tpu.memory_space<vmem>>, %arg9: memref<8x128xf32, #tpu.memory_space<vmem>>, %arg10: memref<1x128xf32, #tpu.memory_space<vmem>>, %arg11: memref<1x128xf32, #tpu.memory_space<vmem>>, %arg12: memref<1x128xf32, #tpu.memory_space<vmem>>, %arg13: memref<128x256xbf16, #tpu.memory_space<vmem>>, %arg14: memref<1x256xf32, #tpu.memory_space<vmem>>, %arg15: memref<1x128xf32, #tpu.memory_space<vmem>>, %arg16: memref<1x128xf32, #tpu.memory_space<vmem>>, %arg17: memref<128x128xbf16, #tpu.memory_space<vmem>>, %arg18: memref<1x128xf32, #tpu.memory_space<vmem>>, %arg19: memref<128x128xbf16, #tpu.memory_space<vmem>>, %arg20: memref<1x128xf32, #tpu.memory_space<vmem>>, %arg21: memref<1x16x128xf32, #tpu.memory_space<vmem>>, %arg22: memref<32x128xf32, #tpu.memory_space<vmem>>) attributes {dimension_semantics = [#tpu.dimension_semantics<parallel>], iteration_bounds = array<i64: 2>, scalar_prefetch = 0 : i64, scratch_operands = 1 : i64, tpu.core_type = #tpu.core_type<tc>, window_params = [{transform_indices = @transform_0, window_bounds = array<i64: 1, 32, 128>}, {transform_indices = @transform_1, window_bounds = array<i64: 1, 1, 128>}, {pipeline_mode = #tpu.pipeline_mode<synchronous>, transform_indices = @transform_2, window_bounds = array<i64: 384, 128>}, {pipeline_mode = #tpu.pipeline_mode<synchronous>, transform_indices = @transform_3, window_bounds = array<i64: 1, 128>}, {pipeline_mode = #tpu.pipeline_mode<synchronous>, transform_indices = @transform_4, window_bounds = array<i64: 1, 128>}, {pipeline_mode = #tpu.pipeline_mode<synchronous>, transform_indices = @transform_5, window_bounds = array<i64: 1, 128>}, {pipeline_mode = #tpu.pipeline_mode<synchronous>, transform_indices = @transform_6, window_bounds = array<i64: 1, 128>}, {pipeline_mode = #tpu.pipeline_mode<synchronous>, transform_indices = @transform_7, window_bounds = array<i64: 1, 128>}, {pipeline_mode = #tpu.pipeline_mode<synchronous>, transform_indices = @transform_8, window_bounds = array<i64: 8, 128>}, {pipeline_mode = #tpu.pipeline_mode<synchronous>, transform_indices = @transform_9, window_bounds = array<i64: 1, 128>}, {pipeline_mode = #tpu.pipeline_mode<synchronous>, transform_indices = @transform_10, window_bounds = array<i64: 1, 128>}, {pipeline_mode = #tpu.pipeline_mode<synchronous>, transform_indices = @transform_11, window_bounds = array<i64: 1, 128>}, {pipeline_mode = #tpu.pipeline_mode<synchronous>, transform_indices = @transform_12, window_bounds = array<i64: 128, 256>}, {pipeline_mode = #tpu.pipeline_mode<synchronous>, transform_indices = @transform_13, window_bounds = array<i64: 1, 256>}, {pipeline_mode = #tpu.pipeline_mode<synchronous>, transform_indices = @transform_14, window_bounds = array<i64: 1, 128>}, {pipeline_mode = #tpu.pipeline_mode<synchronous>, transform_indices = @transform_15, window_bounds = array<i64: 1, 128>}, {pipeline_mode = #tpu.pipeline_mode<synchronous>, transform_indices = @transform_16, window_bounds = array<i64: 128, 128>}, {pipeline_mode = #tpu.pipeline_mode<synchronous>, transform_indices = @transform_17, window_bounds = array<i64: 1, 128>}, {pipeline_mode = #tpu.pipeline_mode<synchronous>, transform_indices = @transform_18, window_bounds = array<i64: 128, 128>}, {pipeline_mode = #tpu.pipeline_mode<synchronous>, transform_indices = @transform_19, window_bounds = array<i64: 1, 128>}, {transform_indices = @transform_20, window_bounds = array<i64: 1, 16, 128>}]} {
    %c0 = arith.constant 0 : index
    %c0_0 = arith.constant 0 : index
    %c0_1 = arith.constant 0 : index
    %0 = vector.load %arg1[%c0, %c0_0, %c0_1] : memref<1x32x128xbf16, #tpu.memory_space<vmem>>, vector<1x32x128xbf16>
    %1 = vector.shape_cast %0 : vector<1x32x128xbf16> to vector<32x128xbf16>
    %2 = arith.extf %1 : vector<32x128xbf16> to vector<32x128xf32>
    %3 = vector.extract_strided_slice %2 {offsets = [7, 0], sizes = [16, 128], strides = [1, 1]} : vector<32x128xf32> to vector<16x128xf32>
    %4 = arith.truncf %3 : vector<16x128xf32> to vector<16x128xbf16>
    %c0_2 = arith.constant 0 : index
    %c0_3 = arith.constant 0 : index
    %5 = vector.load %arg3[%c0_2, %c0_3] : memref<384x128xbf16, #tpu.memory_space<vmem>>, vector<128x128xbf16>
    %cst = arith.constant dense<0.000000e+00> : vector<16x128xf32>
    %6 = tpu.matmul %4, %5, %cst {dimension_numbers = #tpu.dot_dimension_numbers<[1], [0], [0], [1], [0, 0, 1, 1], [], []>} : vector<16x128xbf16>, vector<128x128xbf16>, vector<16x128xf32> -> vector<16x128xf32>
    %7 = vector.extract_strided_slice %2 {offsets = [8, 0], sizes = [16, 128], strides = [1, 1]} : vector<32x128xf32> to vector<16x128xf32>
    %8 = arith.truncf %7 : vector<16x128xf32> to vector<16x128xbf16>
    %c128 = arith.constant 128 : index
    %c0_4 = arith.constant 0 : index
    %9 = vector.load %arg3[%c128, %c0_4] : memref<384x128xbf16, #tpu.memory_space<vmem>>, vector<128x128xbf16>
    %cst_5 = arith.constant dense<0.000000e+00> : vector<16x128xf32>
    %10 = tpu.matmul %8, %9, %cst_5 {dimension_numbers = #tpu.dot_dimension_numbers<[1], [0], [0], [1], [0, 0, 1, 1], [], []>} : vector<16x128xbf16>, vector<128x128xbf16>, vector<16x128xf32> -> vector<16x128xf32>
    %11 = arith.addf %6, %10 : vector<16x128xf32>
    %12 = vector.extract_strided_slice %2 {offsets = [9, 0], sizes = [16, 128], strides = [1, 1]} : vector<32x128xf32> to vector<16x128xf32>
    %13 = arith.truncf %12 : vector<16x128xf32> to vector<16x128xbf16>
    %c256 = arith.constant 256 : index
    %c0_6 = arith.constant 0 : index
    %14 = vector.load %arg3[%c256, %c0_6] : memref<384x128xbf16, #tpu.memory_space<vmem>>, vector<128x128xbf16>
    %cst_7 = arith.constant dense<0.000000e+00> : vector<16x128xf32>
    %15 = tpu.matmul %13, %14, %cst_7 {dimension_numbers = #tpu.dot_dimension_numbers<[1], [0], [0], [1], [0, 0, 1, 1], [], []>} : vector<16x128xbf16>, vector<128x128xbf16>, vector<16x128xf32> -> vector<16x128xf32>
    %16 = arith.addf %11, %15 : vector<16x128xf32>
    %c0_8 = arith.constant 0 : index
    %c0_9 = arith.constant 0 : index
    %17 = vector.load %arg4[%c0_8, %c0_9] : memref<1x128xf32, #tpu.memory_space<vmem>>, vector<1x128xf32>
    %18 = vector.broadcast %17 : vector<1x128xf32> to vector<16x128xf32>
    %19 = arith.addf %16, %18 : vector<16x128xf32>
    %c0_10 = arith.constant 0 : index
    %c0_11 = arith.constant 0 : index
    %20 = vector.load %arg5[%c0_10, %c0_11] : memref<1x128xf32, #tpu.memory_space<vmem>>, vector<1x128xf32>
    %c0_12 = arith.constant 0 : index
    %c0_13 = arith.constant 0 : index
    %21 = vector.load %arg6[%c0_12, %c0_13] : memref<1x128xf32, #tpu.memory_space<vmem>>, vector<1x128xf32>
    %cst_14 = arith.constant dense<0.000000e+00> : vector<16xf32>
    %22 = vector.multi_reduction <add>, %19, %cst_14 [1] : vector<16x128xf32> to vector<16xf32>
    %23 = vector.shape_cast %22 : vector<16xf32> to vector<16x1xf32>
    %cst_15 = arith.constant 3.125000e-02 : f32
    %24 = vector.broadcast %cst_15 : f32 to vector<16x1xf32>
    %25 = arith.mulf %23, %24 : vector<16x1xf32>
    %26 = vector.broadcast %25 : vector<16x1xf32> to vector<16x128xf32>
    %27 = arith.subf %19, %26 : vector<16x128xf32>
    %28 = arith.mulf %27, %27 : vector<16x128xf32>
    %cst_16 = arith.constant dense<0.000000e+00> : vector<16xf32>
    %29 = vector.multi_reduction <add>, %28, %cst_16 [1] : vector<16x128xf32> to vector<16xf32>
    %30 = vector.shape_cast %29 : vector<16xf32> to vector<16x1xf32>
    %31 = arith.mulf %25, %25 : vector<16x1xf32>
    %cst_17 = arith.constant 9.600000e+01 : f32
    %32 = vector.broadcast %cst_17 : f32 to vector<16x1xf32>
    %33 = arith.mulf %32, %31 : vector<16x1xf32>
    %34 = arith.subf %30, %33 : vector<16x1xf32>
    %cst_18 = arith.constant 3.125000e-02 : f32
    %35 = vector.broadcast %cst_18 : f32 to vector<16x1xf32>
    %36 = arith.mulf %34, %35 : vector<16x1xf32>
    %cst_19 = arith.constant 9.99999997E-7 : f32
    %37 = vector.broadcast %cst_19 : f32 to vector<16x1xf32>
    %38 = arith.addf %36, %37 : vector<16x1xf32>
    %39 = math.rsqrt %38 : vector<16x1xf32>
    %40 = vector.broadcast %39 : vector<16x1xf32> to vector<16x128xf32>
    %41 = arith.mulf %27, %40 : vector<16x128xf32>
    %42 = vector.broadcast %20 : vector<1x128xf32> to vector<16x128xf32>
    %43 = arith.mulf %41, %42 : vector<16x128xf32>
    %44 = vector.broadcast %21 : vector<1x128xf32> to vector<16x128xf32>
    %45 = arith.addf %43, %44 : vector<16x128xf32>
    %cst_20 = arith.constant 0.000000e+00 : f32
    %46 = vector.broadcast %cst_20 : f32 to vector<16x128xf32>
    %47 = arith.cmpf ogt, %45, %46 : vector<16x128xf32>
    %cst_21 = arith.constant 0.000000e+00 : f32
    %48 = vector.broadcast %cst_21 : f32 to vector<16x128xf32>
    %49 = arith.minimumf %45, %48 : vector<16x128xf32>
    %50 = math.exp %49 : vector<16x128xf32>
    %cst_22 = arith.constant 1.000000e+00 : f32
    %51 = vector.broadcast %cst_22 : f32 to vector<16x128xf32>
    %52 = arith.subf %50, %51 : vector<16x128xf32>
    %53 = arith.select %47, %45, %52 : vector<16x128xi1>, vector<16x128xf32>
    %c0_23 = arith.constant 0 : index
    %c0_24 = arith.constant 0 : index
    %54 = vector.load %arg7[%c0_23, %c0_24] : memref<1x128xf32, #tpu.memory_space<vmem>>, vector<1x128xf32>
    %c0_25 = arith.constant 0 : index
    %c0_26 = arith.constant 0 : index
    %55 = vector.load %arg8[%c0_25, %c0_26] : memref<1x128xf32, #tpu.memory_space<vmem>>, vector<1x128xf32>
    %56 = arith.mulf %53, %53 : vector<16x128xf32>
    %cst_27 = arith.constant dense<0.000000e+00> : vector<128xf32>
    %57 = vector.multi_reduction <add>, %56, %cst_27 [0] : vector<16x128xf32> to vector<128xf32>
    %58 = vector.shape_cast %57 : vector<128xf32> to vector<1x128xf32>
    %59 = math.sqrt %58 : vector<1x128xf32>
    %cst_28 = arith.constant dense<0.000000e+00> : vector<1xf32>
    %60 = vector.multi_reduction <add>, %59, %cst_28 [1] : vector<1x128xf32> to vector<1xf32>
    %61 = vector.shape_cast %60 : vector<1xf32> to vector<1x1xf32>
    %cst_29 = arith.constant 3.125000e-02 : f32
    %62 = vector.broadcast %cst_29 : f32 to vector<1x1xf32>
    %63 = arith.mulf %61, %62 : vector<1x1xf32>
    %cst_30 = arith.constant 9.99999997E-7 : f32
    %64 = vector.broadcast %cst_30 : f32 to vector<1x1xf32>
    %65 = arith.addf %63, %64 : vector<1x1xf32>
    %66 = vector.broadcast %65 : vector<1x1xf32> to vector<1x128xf32>
    %67 = arith.divf %59, %66 : vector<1x128xf32>
    %68 = vector.broadcast %67 : vector<1x128xf32> to vector<16x128xf32>
    %69 = arith.mulf %53, %68 : vector<16x128xf32>
    %70 = vector.broadcast %54 : vector<1x128xf32> to vector<16x128xf32>
    %71 = arith.mulf %70, %69 : vector<16x128xf32>
    %72 = vector.broadcast %55 : vector<1x128xf32> to vector<16x128xf32>
    %73 = arith.addf %71, %72 : vector<16x128xf32>
    %74 = arith.addf %73, %53 : vector<16x128xf32>
    %c0_31 = arith.constant 0 : index
    %c0_32 = arith.constant 0 : index
    %c0_33 = arith.constant 0 : index
    %75 = vector.load %arg2[%c0_31, %c0_32, %c0_33] : memref<1x1x128xf32, #tpu.memory_space<vmem>>, vector<1x1x128xf32>
    %76 = vector.shape_cast %75 : vector<1x1x128xf32> to vector<1x128xf32>
    %77 = vector.broadcast %76 : vector<1x128xf32> to vector<16x128xf32>
    %78 = arith.addf %74, %77 : vector<16x128xf32>
    %cst_34 = arith.constant 0.000000e+00 : f32
    %79 = vector.broadcast %cst_34 : f32 to vector<8x128xf32>
    %c0_35 = arith.constant 0 : index
    %c0_36 = arith.constant 0 : index
    %80 = vector.load %arg22[%c0_35, %c0_36] : memref<32x128xf32, #tpu.memory_space<vmem>>, vector<8x128xf32>
    tpu.vector_store %arg22[%c0_35, %c0_36], %79 {strides = array<i32>} : memref<32x128xf32, #tpu.memory_space<vmem>>, vector<8x128xf32>,
    %c24 = arith.constant 24 : index
    %c0_37 = arith.constant 0 : index
    %81 = vector.load %arg22[%c24, %c0_37] : memref<32x128xf32, #tpu.memory_space<vmem>>, vector<8x128xf32>
    tpu.vector_store %arg22[%c24, %c0_37], %79 {strides = array<i32>} : memref<32x128xf32, #tpu.memory_space<vmem>>, vector<8x128xf32>,
    %c8 = arith.constant 8 : index
    %c0_38 = arith.constant 0 : index
    %82 = vector.load %arg22[%c8, %c0_38] : memref<32x128xf32, #tpu.memory_space<vmem>>, vector<16x128xf32>
    tpu.vector_store %arg22[%c8, %c0_38], %78 {strides = array<i32>} : memref<32x128xf32, #tpu.memory_space<vmem>>, vector<16x128xf32>,
    %c0_39 = arith.constant 0 : index
    %c0_40 = arith.constant 0 : index
    %83 = vector.load %arg9[%c0_39, %c0_40] : memref<8x128xf32, #tpu.memory_space<vmem>>, vector<8x128xf32>
    %c5 = arith.constant 5 : index
    %c0_41 = arith.constant 0 : index
    %84 = vector.load %arg22[%c5, %c0_41] : memref<32x128xf32, #tpu.memory_space<vmem>>, vector<16x128xf32>
    %85 = vector.extract_strided_slice %83 {offsets = [0, 0], sizes = [1, 128], strides = [1, 1]} : vector<8x128xf32> to vector<1x128xf32>
    %86 = vector.broadcast %85 : vector<1x128xf32> to vector<16x128xf32>
    %87 = arith.mulf %84, %86 : vector<16x128xf32>
    %c6 = arith.constant 6 : index
    %c0_42 = arith.constant 0 : index
    %88 = vector.load %arg22[%c6, %c0_42] : memref<32x128xf32, #tpu.memory_space<vmem>>, vector<16x128xf32>
    %89 = vector.extract_strided_slice %83 {offsets = [1, 0], sizes = [1, 128], strides = [1, 1]} : vector<8x128xf32> to vector<1x128xf32>
    %90 = vector.broadcast %89 : vector<1x128xf32> to vector<16x128xf32>
    %91 = arith.mulf %88, %90 : vector<16x128xf32>
    %92 = arith.addf %87, %91 : vector<16x128xf32>
    %c7 = arith.constant 7 : index
    %c0_43 = arith.constant 0 : index
    %93 = vector.load %arg22[%c7, %c0_43] : memref<32x128xf32, #tpu.memory_space<vmem>>, vector<16x128xf32>
    %94 = vector.extract_strided_slice %83 {offsets = [2, 0], sizes = [1, 128], strides = [1, 1]} : vector<8x128xf32> to vector<1x128xf32>
    %95 = vector.broadcast %94 : vector<1x128xf32> to vector<16x128xf32>
    %96 = arith.mulf %93, %95 : vector<16x128xf32>
    %97 = arith.addf %92, %96 : vector<16x128xf32>
    %c8_44 = arith.constant 8 : index
    %c0_45 = arith.constant 0 : index
    %98 = vector.load %arg22[%c8_44, %c0_45] : memref<32x128xf32, #tpu.memory_space<vmem>>, vector<16x128xf32>
    %99 = vector.extract_strided_slice %83 {offsets = [3, 0], sizes = [1, 128], strides = [1, 1]} : vector<8x128xf32> to vector<1x128xf32>
    %100 = vector.broadcast %99 : vector<1x128xf32> to vector<16x128xf32>
    %101 = arith.mulf %98, %100 : vector<16x128xf32>
    %102 = arith.addf %97, %101 : vector<16x128xf32>
    %c9 = arith.constant 9 : index
    %c0_46 = arith.constant 0 : index
    %103 = vector.load %arg22[%c9, %c0_46] : memref<32x128xf32, #tpu.memory_space<vmem>>, vector<16x128xf32>
    %104 = vector.extract_strided_slice %83 {offsets = [4, 0], sizes = [1, 128], strides = [1, 1]} : vector<8x128xf32> to vector<1x128xf32>
    %105 = vector.broadcast %104 : vector<1x128xf32> to vector<16x128xf32>
    %106 = arith.mulf %103, %105 : vector<16x128xf32>
    %107 = arith.addf %102, %106 : vector<16x128xf32>
    %c10 = arith.constant 10 : index
    %c0_47 = arith.constant 0 : index
    %108 = vector.load %arg22[%c10, %c0_47] : memref<32x128xf32, #tpu.memory_space<vmem>>, vector<16x128xf32>
    %109 = vector.extract_strided_slice %83 {offsets = [5, 0], sizes = [1, 128], strides = [1, 1]} : vector<8x128xf32> to vector<1x128xf32>
    %110 = vector.broadcast %109 : vector<1x128xf32> to vector<16x128xf32>
    %111 = arith.mulf %108, %110 : vector<16x128xf32>
    %112 = arith.addf %107, %111 : vector<16x128xf32>
    %c11 = arith.constant 11 : index
    %c0_48 = arith.constant 0 : index
    %113 = vector.load %arg22[%c11, %c0_48] : memref<32x128xf32, #tpu.memory_space<vmem>>, vector<16x128xf32>
    %114 = vector.extract_strided_slice %83 {offsets = [6, 0], sizes = [1, 128], strides = [1, 1]} : vector<8x128xf32> to vector<1x128xf32>
    %115 = vector.broadcast %114 : vector<1x128xf32> to vector<16x128xf32>
    %116 = arith.mulf %113, %115 : vector<16x128xf32>
    %117 = arith.addf %112, %116 : vector<16x128xf32>
    %c0_49 = arith.constant 0 : index
    %c0_50 = arith.constant 0 : index
    %118 = vector.load %arg10[%c0_49, %c0_50] : memref<1x128xf32, #tpu.memory_space<vmem>>, vector<1x128xf32>
    %119 = vector.broadcast %118 : vector<1x128xf32> to vector<16x128xf32>
    %120 = arith.addf %117, %119 : vector<16x128xf32>
    %c0_51 = arith.constant 0 : index
    %c0_52 = arith.constant 0 : index
    %121 = vector.load %arg11[%c0_51, %c0_52] : memref<1x128xf32, #tpu.memory_space<vmem>>, vector<1x128xf32>
    %c0_53 = arith.constant 0 : index
    %c0_54 = arith.constant 0 : index
    %122 = vector.load %arg12[%c0_53, %c0_54] : memref<1x128xf32, #tpu.memory_space<vmem>>, vector<1x128xf32>
    %cst_55 = arith.constant dense<0.000000e+00> : vector<16xf32>
    %123 = vector.multi_reduction <add>, %120, %cst_55 [1] : vector<16x128xf32> to vector<16xf32>
    %124 = vector.shape_cast %123 : vector<16xf32> to vector<16x1xf32>
    %cst_56 = arith.constant 3.125000e-02 : f32
    %125 = vector.broadcast %cst_56 : f32 to vector<16x1xf32>
    %126 = arith.mulf %124, %125 : vector<16x1xf32>
    %127 = vector.broadcast %126 : vector<16x1xf32> to vector<16x128xf32>
    %128 = arith.subf %120, %127 : vector<16x128xf32>
    %129 = arith.mulf %128, %128 : vector<16x128xf32>
    %cst_57 = arith.constant dense<0.000000e+00> : vector<16xf32>
    %130 = vector.multi_reduction <add>, %129, %cst_57 [1] : vector<16x128xf32> to vector<16xf32>
    %131 = vector.shape_cast %130 : vector<16xf32> to vector<16x1xf32>
    %132 = arith.mulf %126, %126 : vector<16x1xf32>
    %cst_58 = arith.constant 9.600000e+01 : f32
    %133 = vector.broadcast %cst_58 : f32 to vector<16x1xf32>
    %134 = arith.mulf %133, %132 : vector<16x1xf32>
    %135 = arith.subf %131, %134 : vector<16x1xf32>
    %cst_59 = arith.constant 3.125000e-02 : f32
    %136 = vector.broadcast %cst_59 : f32 to vector<16x1xf32>
    %137 = arith.mulf %135, %136 : vector<16x1xf32>
    %cst_60 = arith.constant 9.99999997E-7 : f32
    %138 = vector.broadcast %cst_60 : f32 to vector<16x1xf32>
    %139 = arith.addf %137, %138 : vector<16x1xf32>
    %140 = math.rsqrt %139 : vector<16x1xf32>
    %141 = vector.broadcast %140 : vector<16x1xf32> to vector<16x128xf32>
    %142 = arith.mulf %128, %141 : vector<16x128xf32>
    %143 = vector.broadcast %121 : vector<1x128xf32> to vector<16x128xf32>
    %144 = arith.mulf %142, %143 : vector<16x128xf32>
    %145 = vector.broadcast %122 : vector<1x128xf32> to vector<16x128xf32>
    %146 = arith.addf %144, %145 : vector<16x128xf32>
    %147 = arith.truncf %146 : vector<16x128xf32> to vector<16x128xbf16>
    %c0_61 = arith.constant 0 : index
    %c0_62 = arith.constant 0 : index
    %148 = vector.load %arg13[%c0_61, %c0_62] : memref<128x256xbf16, #tpu.memory_space<vmem>>, vector<128x256xbf16>
    %cst_63 = arith.constant dense<0.000000e+00> : vector<16x256xf32>
    %149 = tpu.matmul %147, %148, %cst_63 {dimension_numbers = #tpu.dot_dimension_numbers<[1], [0], [0], [1], [0, 0, 1, 1], [], []>} : vector<16x128xbf16>, vector<128x256xbf16>, vector<16x256xf32> -> vector<16x256xf32>
    %c0_64 = arith.constant 0 : index
    %c0_65 = arith.constant 0 : index
    %150 = vector.load %arg14[%c0_64, %c0_65] : memref<1x256xf32, #tpu.memory_space<vmem>>, vector<1x256xf32>
    %151 = vector.broadcast %150 : vector<1x256xf32> to vector<16x256xf32>
    %152 = arith.addf %149, %151 : vector<16x256xf32>
    %153 = vector.extract_strided_slice %152 {offsets = [0, 0], sizes = [16, 128], strides = [1, 1]} : vector<16x256xf32> to vector<16x128xf32>
    %154 = vector.extract_strided_slice %152 {offsets = [0, 128], sizes = [16, 128], strides = [1, 1]} : vector<16x256xf32> to vector<16x128xf32>
    %155 = arith.negf %154 : vector<16x128xf32>
    %156 = math.exp %155 : vector<16x128xf32>
    %cst_66 = arith.constant 1.000000e+00 : f32
    %157 = vector.broadcast %cst_66 : f32 to vector<16x128xf32>
    %158 = arith.addf %157, %156 : vector<16x128xf32>
    %159 = arith.divf %157, %158 : vector<16x128xf32>
    %160 = arith.mulf %153, %159 : vector<16x128xf32>
    %c0_67 = arith.constant 0 : index
    %c0_68 = arith.constant 0 : index
    %161 = vector.load %arg15[%c0_67, %c0_68] : memref<1x128xf32, #tpu.memory_space<vmem>>, vector<1x128xf32>
    %c0_69 = arith.constant 0 : index
    %c0_70 = arith.constant 0 : index
    %162 = vector.load %arg16[%c0_69, %c0_70] : memref<1x128xf32, #tpu.memory_space<vmem>>, vector<1x128xf32>
    %163 = arith.mulf %160, %160 : vector<16x128xf32>
    %cst_71 = arith.constant dense<0.000000e+00> : vector<128xf32>
    %164 = vector.multi_reduction <add>, %163, %cst_71 [0] : vector<16x128xf32> to vector<128xf32>
    %165 = vector.shape_cast %164 : vector<128xf32> to vector<1x128xf32>
    %166 = math.sqrt %165 : vector<1x128xf32>
    %cst_72 = arith.constant dense<0.000000e+00> : vector<1xf32>
    %167 = vector.multi_reduction <add>, %166, %cst_72 [1] : vector<1x128xf32> to vector<1xf32>
    %168 = vector.shape_cast %167 : vector<1xf32> to vector<1x1xf32>
    %cst_73 = arith.constant 1.562500e-02 : f32
    %169 = vector.broadcast %cst_73 : f32 to vector<1x1xf32>
    %170 = arith.mulf %168, %169 : vector<1x1xf32>
    %cst_74 = arith.constant 9.99999997E-7 : f32
    %171 = vector.broadcast %cst_74 : f32 to vector<1x1xf32>
    %172 = arith.addf %170, %171 : vector<1x1xf32>
    %173 = vector.broadcast %172 : vector<1x1xf32> to vector<1x128xf32>
    %174 = arith.divf %166, %173 : vector<1x128xf32>
    %175 = vector.broadcast %174 : vector<1x128xf32> to vector<16x128xf32>
    %176 = arith.mulf %160, %175 : vector<16x128xf32>
    %177 = vector.broadcast %161 : vector<1x128xf32> to vector<16x128xf32>
    %178 = arith.mulf %177, %176 : vector<16x128xf32>
    %179 = vector.broadcast %162 : vector<1x128xf32> to vector<16x128xf32>
    %180 = arith.addf %178, %179 : vector<16x128xf32>
    %181 = arith.addf %180, %160 : vector<16x128xf32>
    %182 = arith.truncf %181 : vector<16x128xf32> to vector<16x128xbf16>
    %c0_75 = arith.constant 0 : index
    %c0_76 = arith.constant 0 : index
    %183 = vector.load %arg17[%c0_75, %c0_76] : memref<128x128xbf16, #tpu.memory_space<vmem>>, vector<128x128xbf16>
    %cst_77 = arith.constant dense<0.000000e+00> : vector<16x128xf32>
    %184 = tpu.matmul %182, %183, %cst_77 {dimension_numbers = #tpu.dot_dimension_numbers<[1], [0], [0], [1], [0, 0, 1, 1], [], []>} : vector<16x128xbf16>, vector<128x128xbf16>, vector<16x128xf32> -> vector<16x128xf32>
    %c0_78 = arith.constant 0 : index
    %c0_79 = arith.constant 0 : index
    %185 = vector.load %arg18[%c0_78, %c0_79] : memref<1x128xf32, #tpu.memory_space<vmem>>, vector<1x128xf32>
    %186 = vector.broadcast %185 : vector<1x128xf32> to vector<16x128xf32>
    %187 = arith.addf %184, %186 : vector<16x128xf32>
    %188 = arith.addf %78, %187 : vector<16x128xf32>
    %189 = arith.truncf %188 : vector<16x128xf32> to vector<16x128xbf16>
    %c0_80 = arith.constant 0 : index
    %c0_81 = arith.constant 0 : index
    %190 = vector.load %arg19[%c0_80, %c0_81] : memref<128x128xbf16, #tpu.memory_space<vmem>>, vector<128x128xbf16>
    %cst_82 = arith.constant dense<0.000000e+00> : vector<16x128xf32>
    %191 = tpu.matmul %189, %190, %cst_82 {dimension_numbers = #tpu.dot_dimension_numbers<[1], [0], [0], [1], [0, 0, 1, 1], [], []>} : vector<16x128xbf16>, vector<128x128xbf16>, vector<16x128xf32> -> vector<16x128xf32>
    %c0_83 = arith.constant 0 : index
    %c0_84 = arith.constant 0 : index
    %192 = vector.load %arg20[%c0_83, %c0_84] : memref<1x128xf32, #tpu.memory_space<vmem>>, vector<1x128xf32>
    %193 = vector.broadcast %192 : vector<1x128xf32> to vector<16x128xf32>
    %194 = arith.addf %191, %193 : vector<16x128xf32>
    %c0_85 = arith.constant 0 : index
    %c0_86 = arith.constant 0 : index
    %c0_87 = arith.constant 0 : index
    %195 = vector.load %arg21[%c0_85, %c0_86, %c0_87] : memref<1x16x128xf32, #tpu.memory_space<vmem>>, vector<1x16x128xf32>
    %196 = vector.shape_cast %195 : vector<1x16x128xf32> to vector<16x128xf32>
    %197 = vector.shape_cast %194 : vector<16x128xf32> to vector<1x16x128xf32>
    tpu.vector_store %arg21[%c0_85, %c0_86, %c0_87], %197 {strides = array<i32>} : memref<1x16x128xf32, #tpu.memory_space<vmem>>, vector<1x16x128xf32>,
    return
  }
  func.func @transform_0(%arg0: i32) -> (i32, i32, i32) {
    %c0_i32 = arith.constant 0 : i32
    %c0_i32_0 = arith.constant 0 : i32
    %c0_i32_1 = arith.constant 0 : i32
    return %arg0, %c0_i32, %c0_i32_0 : i32, i32, i32
  }
  func.func @transform_1(%arg0: i32) -> (i32, i32, i32) {
    %c0_i32 = arith.constant 0 : i32
    %c0_i32_0 = arith.constant 0 : i32
    %c0_i32_1 = arith.constant 0 : i32
    return %arg0, %c0_i32, %c0_i32_0 : i32, i32, i32
  }
  func.func @transform_2(%arg0: i32) -> (i32, i32) {
    %c0_i32 = arith.constant 0 : i32
    %c0_i32_0 = arith.constant 0 : i32
    %c0_i32_1 = arith.constant 0 : i32
    return %c0_i32, %c0_i32_0 : i32, i32
  }
  func.func @transform_3(%arg0: i32) -> (i32, i32) {
    %c0_i32 = arith.constant 0 : i32
    %c0_i32_0 = arith.constant 0 : i32
    %c0_i32_1 = arith.constant 0 : i32
    return %c0_i32, %c0_i32_0 : i32, i32
  }
  func.func @transform_4(%arg0: i32) -> (i32, i32) {
    %c0_i32 = arith.constant 0 : i32
    %c0_i32_0 = arith.constant 0 : i32
    %c0_i32_1 = arith.constant 0 : i32
    return %c0_i32, %c0_i32_0 : i32, i32
  }
  func.func @transform_5(%arg0: i32) -> (i32, i32) {
    %c0_i32 = arith.constant 0 : i32
    %c0_i32_0 = arith.constant 0 : i32
    %c0_i32_1 = arith.constant 0 : i32
    return %c0_i32, %c0_i32_0 : i32, i32
  }
  func.func @transform_6(%arg0: i32) -> (i32, i32) {
    %c0_i32 = arith.constant 0 : i32
    %c0_i32_0 = arith.constant 0 : i32
    %c0_i32_1 = arith.constant 0 : i32
    return %c0_i32, %c0_i32_0 : i32, i32
  }
  func.func @transform_7(%arg0: i32) -> (i32, i32) {
    %c0_i32 = arith.constant 0 : i32
    %c0_i32_0 = arith.constant 0 : i32
    %c0_i32_1 = arith.constant 0 : i32
    return %c0_i32, %c0_i32_0 : i32, i32
  }
  func.func @transform_8(%arg0: i32) -> (i32, i32) {
    %c0_i32 = arith.constant 0 : i32
    %c0_i32_0 = arith.constant 0 : i32
    %c0_i32_1 = arith.constant 0 : i32
    return %c0_i32, %c0_i32_0 : i32, i32
  }
  func.func @transform_9(%arg0: i32) -> (i32, i32) {
    %c0_i32 = arith.constant 0 : i32
    %c0_i32_0 = arith.constant 0 : i32
    %c0_i32_1 = arith.constant 0 : i32
    return %c0_i32, %c0_i32_0 : i32, i32
  }
  func.func @transform_10(%arg0: i32) -> (i32, i32) {
    %c0_i32 = arith.constant 0 : i32
    %c0_i32_0 = arith.constant 0 : i32
    %c0_i32_1 = arith.constant 0 : i32
    return %c0_i32, %c0_i32_0 : i32, i32
  }
  func.func @transform_11(%arg0: i32) -> (i32, i32) {
    %c0_i32 = arith.constant 0 : i32
    %c0_i32_0 = arith.constant 0 : i32
    %c0_i32_1 = arith.constant 0 : i32
    return %c0_i32, %c0_i32_0 : i32, i32
  }
  func.func @transform_12(%arg0: i32) -> (i32, i32) {
    %c0_i32 = arith.constant 0 : i32
    %c0_i32_0 = arith.constant 0 : i32
    %c0_i32_1 = arith.constant 0 : i32
    return %c0_i32, %c0_i32_0 : i32, i32
  }
  func.func @transform_13(%arg0: i32) -> (i32, i32) {
    %c0_i32 = arith.constant 0 : i32
    %c0_i32_0 = arith.constant 0 : i32
    %c0_i32_1 = arith.constant 0 : i32
    return %c0_i32, %c0_i32_0 : i32, i32
  }
  func.func @transform_14(%arg0: i32) -> (i32, i32) {
    %c0_i32 = arith.constant 0 : i32
    %c0_i32_0 = arith.constant 0 : i32
    %c0_i32_1 = arith.constant 0 : i32
    return %c0_i32, %c0_i32_0 : i32, i32
  }
  func.func @transform_15(%arg0: i32) -> (i32, i32) {
    %c0_i32 = arith.constant 0 : i32
    %c0_i32_0 = arith.constant 0 : i32
    %c0_i32_1 = arith.constant 0 : i32
    return %c0_i32, %c0_i32_0 : i32, i32
  }
  func.func @transform_16(%arg0: i32) -> (i32, i32) {
    %c0_i32 = arith.constant 0 : i32
    %c0_i32_0 = arith.constant 0 : i32
    %c0_i32_1 = arith.constant 0 : i32
    return %c0_i32, %c0_i32_0 : i32, i32
  }
  func.func @transform_17(%arg0: i32) -> (i32, i32) {
    %c0_i32 = arith.constant 0 : i32
    %c0_i32_0 = arith.constant 0 : i32
    %c0_i32_1 = arith.constant 0 : i32
    return %c0_i32, %c0_i32_0 : i32, i32
  }
  func.func @transform_18(%arg0: i32) -> (i32, i32) {
    %c0_i32 = arith.constant 0 : i32
    %c0_i32_0 = arith.constant 0 : i32
    %c0_i32_1 = arith.constant 0 : i32
    return %c0_i32, %c0_i32_0 : i32, i32
  }
  func.func @transform_19(%arg0: i32) -> (i32, i32) {
    %c0_i32 = arith.constant 0 : i32
    %c0_i32_0 = arith.constant 0 : i32
    %c0_i32_1 = arith.constant 0 : i32
    return %c0_i32, %c0_i32_0 : i32, i32
  }
  func.func @transform_20(%arg0: i32) -> (i32, i32, i32) {
    %c0_i32 = arith.constant 0 : i32
    %c0_i32_0 = arith.constant 0 : i32
    %c0_i32_1 = arith.constant 0 : i32
    return %arg0, %c0_i32, %c0_i32_0 : i32, i32, i32
  }
}

</mosaic_0001>

<bundles_post_ra>
// kernel: tpu_custom_call.1
= control target key start
LH: loop header
LB: loop body
LE: loop exit
PB: predicated region body
PF: predicated region fallthrough
CT: control target
= control target key end

     0   :  { %s3119_s0 = inlined_call_operand.hbm [shape: bf16[2,32,128], index: 0, kind: input, shape index: {}]   ;;  %s3120_s1 = inlined_call_operand.hbm [shape: f32[2,1,128], index: 1, kind: input, shape index: {}]   ;;  %s3121_s2 = inlined_call_operand.hbm [shape: bf16[384,128], index: 2, kind: input, shape index: {}]   ;;  %s3122_s3 = inlined_call_operand.vmem [shape: f32[1,128], index: 3, kind: input, shape index: {}]   ;;  %s3123_s4 = inlined_call_operand.hbm [shape: f32[1,128], index: 4, kind: input, shape index: {}]   ;;  %s3124_s5 = inlined_call_operand.vmem [shape: f32[1,128], index: 5, kind: input, shape index: {}]   ;;  %s3125_s6 = inlined_call_operand.vmem [shape: f32[1,128], index: 6, kind: input, shape index: {}]   ;;  %s3126_s7 = inlined_call_operand.vmem [shape: f32[1,128], index: 7, kind: input, shape index: {}]   ;;  %s3127_s8 = inlined_call_operand.hbm [shape: f32[8,128], index: 8, kind: input, shape index: {}]   ;;  %s3128_s9 = inlined_call_operand.vmem [shape: f32[1,128], index: 9, kind: input, shape index: {}]   ;;  %s3129_s10 = inlined_call_operand.vmem [shape: f32[1,128], index: 10, kind: input, shape index: {}]   ;;  %s3130_s11 = inlined_call_operand.vmem [shape: f32[1,128], index: 11, kind: input, shape index: {}]   ;;  %s3131_s12 = inlined_call_operand.hbm [shape: bf16[128,256], index: 12, kind: input, shape index: {}]   ;;  %s3132_s13 = inlined_call_operand.vmem [shape: f32[1,256], index: 13, kind: input, shape index: {}]   ;;  %s3133_s14 = inlined_call_operand.vmem [shape: f32[1,128], index: 14, kind: input, shape index: {}]   ;;  %s3134_s15 = inlined_call_operand.vmem [shape: f32[1,128], index: 15, kind: input, shape index: {}]   ;;  %s3135_s16 = inlined_call_operand.hbm [shape: bf16[128,128], index: 16, kind: input, shape index: {}]   ;;  %s3136_s17 = inlined_call_operand.vmem [shape: f32[1,128], index: 17, kind: input, shape index: {}]   ;;  %s3137_s18 = inlined_call_operand.hbm [shape: bf16[128,128], index: 18, kind: input, shape index: {}]   ;;  %s3138_s19 = inlined_call_operand.vmem [shape: f32[1,128], index: 19, kind: input, shape index: {}]   ;;  %s3139_s20 = inlined_call_operand.hbm [shape: f32[2,16,128], index: 20, kind: output, shape index: {}]  }
   0x1   :  { %3155 = sst [smem:[#allocation31_spill]] %s3119_s0 }
   0x2   :  { %3156 = sst [smem:[#allocation32_spill]] %s3120_s1 }
   0x3   :  { %3157 = sst [smem:[#allocation33_spill]] %s3121_s2 }
   0x4   :  { %3158 = sst [smem:[#allocation34_spill]] %s3122_s3 }
   0x5   :  { %3159 = sst [smem:[#allocation35_spill]] %s3123_s4 }
   0x6   :  { %3160 = sst [smem:[#allocation36_spill]] %s3127_s8 }
   0x7   :  { %3161 = sst [smem:[#allocation37_spill]] %s3131_s12 }
   0x8   :  { %3162 = sst [smem:[#allocation38_spill]] %s3133_s14 }
   0x9   :  { %3163 = sst [smem:[#allocation39_spill]] %s3134_s15 }
   0xa   :  { %3164 = sst [smem:[#allocation40_spill]] %s3135_s16 }
   0xb   :  { %3165 = sst [smem:[#allocation41_spill]] %s3136_s17 }
   0xc   :  { %3166 = sst [smem:[#allocation42_spill]] %s3137_s18 }
   0xd   :  { %3167 = sst [smem:[#allocation43_spill]] %s3138_s19 }
   0xe   :  { %3168 = sst [smem:[#allocation44_spill]] %s3139_s20 }
   0xf   :  { %25 = vsyncpa [#allocation4], 0 }
  0x10   :  { %27 = vsyncpa [#allocation4 + $0x1], 0 }
  0x11   :  { %28 = vsyncpa [#allocation7], 0 }
  0x12   :  { %30 = vsyncpa [#allocation7 + $0x1], 0 }
  0x13   :  { %31 = vsyncpa [#allocation10], 0 }
  0x14   :  { %32 = vsyncpa [#allocation13], 0 }
  0x15   :  { %33 = vsyncpa [#allocation16], 0 }
  0x16   :  { %34 = vsyncpa [#allocation5], 0 }
  0x17   :  { %36 = vsyncpa [#allocation5 + $0x1], 0  ;;  %s2804_s1 = smov 0   ;;  %s2806_s22 = smov 0  }
  0x18   :  { %s2808_s23 = smov 0   ;;  %s2810_s24 = smov 0  }
  0x19 LB: > { %3169 = sst [smem:[#allocation25_spill]] %s2672_s1  ;;  %s2828_s27 = sadd.s32 4294967295, %s2684_s24   ;;  %s2684_s24 = sphi %s2810_s24, %s3202_s24   ;;  %s2680_s23 = sphi %s2808_s23, %s3204_s23   ;;  %s2676_s22 = sphi %s2806_s22, %s3206_s22   ;;  %s2672_s1 = sphi %s2804_s1, %s3205_s1  }
  0x1a   : > { %3170 = sst [smem:[#allocation26_spill]] %s2680_s23  ;;  %p1878_p0 = scmp.ge.s32.totalorder %s2684_s24, 1 }
  0x1b   : > { %s3171_s3 = sld [smem:[#allocation33_spill]]  ;;  %p63_p1 = scmp.eq.s32.totalorder %s2828_s27, 0 }
  0x1c   : > { %p503_p2 = scmp.lt.s32.totalorder %s2684_s24, 3  ;;  %s2686_s4 = smov [#allocation8]  }
  0x1d   : > { %s516_s29 = sshll.u32 %s2686_s4, 4  ;;  %s3173_s21 = sld [smem:[#allocation35_spill]]  ;;  %s517_s29 = int_to_ptr.vmem [resolvable:$true] %s516_s29 }
  0x1e   : > { %p2833_p3 = pnand %p1878_p0, %p503_p2  ;;  %s3175_s12 = sld [smem:[#allocation37_spill]] }
  0x1f   : > { %s2687_s19 = smov [#allocation9]   ;;  %s3143_s15 = smov 64  }
  0x20   : > { %p2228_p4 = pneg %p2833_p3  ;;  %s534_s17 = sshll.u32 %s2687_s19, 4  ;;  %s535_s17 = int_to_ptr.vmem [resolvable:$true] %s534_s17 }
  0x21   : > { %s514_s26 = sshll.u32 %s3171_s3, 4  ;;  %s3145_s14 = smov 4   ;;  %s515_s26 = int_to_ptr.hbm [resolvable:$true] %s514_s26 }
  0x22   : > { %p2845_p6 = pnand %p2228_p4, %p63_p1  ;;  %s2690_s30 = smov [#allocation12]  }
  0x23   : > { %s532_s2 = sshll.u32 %s3173_s21, 4  ;;  %s575_s0 = sshll.u32 %s2690_s30, 4  ;;  %s533_s2 = int_to_ptr.hbm [resolvable:$true] %s532_s2  ;;  %s576_s0 = int_to_ptr.vmem [resolvable:$true] %s575_s0 }
  0x24   : > { %s573_s4 = sshll.u32 %s3175_s12, 4  ;;  %s3176_s8 = sld [smem:[#allocation36_spill]]  ;;  %s574_s4 = int_to_ptr.hbm [resolvable:$true] %s573_s4 }
  0x25   : > { %2231 = dma.hbm_to_vmem [thread:$0]  (!%p2845_p6), %s515_s26, 3072, %s517_s29, [#allocation7], %s3143_s15, %s3143_s15, %s3145_s14  }
  0x26   : > { %2234 = dma.hbm_to_vmem [thread:$0]  (!%p2845_p6), %s533_s2, 16, %s535_s17, [#allocation10]  }
  0x27   : > { %s2691_s19 = smov 128   ;;  %s2692_s12 = smov 8  }
  0x28   : > { %2240 = dma.hbm_to_vmem [thread:$0]  (!%p2845_p6), %s574_s4, 2048, %s576_s0, [#allocation13], %s2691_s19, %s2691_s19, %s2692_s12  }
  0x29   : > { %s2693_s26 = smov [#allocation11]   ;;  %s3177_s16 = sld [smem:[#allocation40_spill]] }
  0x2a   : > { %s553_s3 = sshll.u32 %s3176_s8, 4  ;;  %s555_s29 = sshll.u32 %s2693_s26, 4  ;;  %s554_s3 = int_to_ptr.hbm [resolvable:$true] %s553_s3  ;;  %s556_s29 = int_to_ptr.vmem [resolvable:$true] %s555_s29 }
  0x2b   : > { %2237 = dma.hbm_to_vmem [thread:$0]  (!%p2845_p6), %s554_s3, 128, %s556_s29, [#allocation10]  }
  0x2c   : > { %s3178_s18 = sld [smem:[#allocation42_spill]]  ;;  %s2694_s4 = smov [#allocation14]  }
  0x2d   : > { %s598_s0 = sshll.u32 %s2694_s4, 4  ;;  %s3179_s14 = smov 4   ;;  %s599_s0 = int_to_ptr.vmem [resolvable:$true] %s598_s0 }
  0x2e   : > { %s3180_s15 = smov 64   ;;  %s2695_s20 = smov [#allocation15]  }
  0x2f   : > { %s596_s17 = sshll.u32 %s3177_s16, 4  ;;  %s615_s21 = sshll.u32 %s2695_s20, 4  ;;  %s597_s17 = int_to_ptr.hbm [resolvable:$true] %s596_s17  ;;  %s616_s21 = int_to_ptr.vmem [resolvable:$true] %s615_s21 }
  0x30   : > { %2243 = dma.hbm_to_vmem [thread:$0]  (!%p2845_p6), %s597_s17, 1024, %s599_s0, [#allocation13], %s3180_s15, %s3180_s15, %s3179_s14  }
  0x31   : > { %s1877_s3 = sadd.s32 4294967294, %s2684_s24   ;;  %s2884_s19 = sadd.s32 1, %s2684_s24  }
  0x32   : > { %s613_s12 = sshll.u32 %s3178_s18, 4  ;;  %3181 = sst [smem:[#allocation27_spill]] %s2884_s19  ;;  %s614_s12 = int_to_ptr.hbm [resolvable:$true] %s613_s12 }
  0x33   : > { %2246 = dma.hbm_to_vmem [thread:$0]  (!%p2845_p6), %s614_s12, 1024, %s616_s21, [#allocation16], %s3180_s15, %s3180_s15, %s3179_s14  }
  0x34   : > { %s46_s26 = ssub.s32 %s2684_s24, %s2884_s19  ;;  %s49_s29 = sadd.s32 1, %s2680_s23 }
  0x35   : > { %p47_p7 = scmp.eq.s32.totalorder %s46_s26, 0  ;;  %p56_p8 = scmp.ne.s32.totalorder %s2680_s23, %s2676_s22 }
  0x36   : > { %p57_p9 = scmp.eq.s32.totalorder %s2684_s24, 0  ;;  %p62_p10 = scmp.ne.s32.totalorder %s2676_s22, %s2672_s1 }
  0x37   : > { %s2895_s17 = scalar_select %p47_p7, %s2680_s23, %s49_s29  }
  0x38   : > { %p2897_p11 = por %p57_p9, %p56_p8  ;;  %p2903_p12 = por %p63_p1, %p62_p10 }
  0x39   : > { %3182 = sst [smem:[#allocation28_spill]] %s2895_s17  ;;  %p490_p13 = scmp.eq.s32.totalorder %s2828_s27, 1 }
  0x3a   : > { %p496_p0 = scmp.eq.s32.totalorder %s1877_s3, 1  ;;  %p2264_p2 = scmp.lt.s32.totalorder %s2684_s24, 2 }
  0x3b   : > { %s2910_s30 = sand.u32 1, %s2680_s23   ;;  %p2912_p4 = por %p490_p13, %p56_p8 }
  0x3c   : > { %p2916_p6 = por %p496_p0, %p62_p10  ;;  %s1886_s0 = sshll.u32 %s2910_s30, 4 }
  0x3d   : > { %s3185_s12 = scalar_select %p2912_p4, 1, 0 }
  0x3e   : > { %s3187_s4 = scalar_select %p2916_p6, 1, 0 }
  0x3f   : > { %3186 = sst [smem:[#allocation29_spill]] %s3185_s12  ;;  %s2131_s20 = sshll.u32 %s2684_s24, 4 }
  0x40   : > { %3188 = sst [smem:[#allocation30_spill]] %s3187_s4  ;;  %s636_s3 = scalar_lea.vmem [#allocation3], %s1886_s0 }
  0x41   : > { %s3189_s29 = sld [smem:[#allocation31_spill]]  ;;  %s644_s16 = sshll.u32 %s636_s3, 4  ;;  %s645_s16 = int_to_ptr.vmem [resolvable:$true] %s644_s16 }
  0x42   : > { %p2927_p7 = pnand %p2264_p2, %p2897_p11  ;;  %s654_s23 = sand.u32 1, %s2684_s24  }
  0x43   : > { %s633_s19 = scalar_lea.sflag [#allocation4], %s2910_s30 }
  0x44   : > { %p2542_p9 = pneg %p2927_p7 }
  0x47   : > { %s641_s8 = scalar_lea.hbm %s3189_s29, %s2131_s20  ;;  %s2545_s0 = scalar_lea.hbm %s3189_s29, 32 }
  0x48   : > { %s642_s18 = sshll.u32 %s641_s8, 4  ;;  %s643_s18 = int_to_ptr.hbm [resolvable:$true] %s642_s18 }
  0x49   : > { %s2538_s4 = sshra.s32 %s643_s18, 4  ;;  %s2539_s4 = int_to_ptr.hbm [resolvable:$true] %s2538_s4 }
  0x4a   : > { %s2540_s1 = scalar_lea.hbm %s2539_s4, 16  ;;  %p2546_p11 = scmp.lt.s32.totalorder %s2539_s4, %s3189_s29 }
  0x4b   : > { %p2541_p8 = scmp.ne.s32.totalorder %s2539_s4, %s2540_s1  ;;  %p2547_p0 = scmp.lt.s32.totalorder %s2545_s0, %s2540_s1 }
  0x4d   : > { %p2543_p10 = pnand %p2542_p9, %p2541_p8  ;;  %p2548_p2 = por %p2547_p0, %p2546_p11 }
  0x4f   : > { %p2544_p13 = pneg %p2543_p10 }
  0x51   : > { %p2549_p5 = pnand %p2548_p2, %p2544_p13 }
  0x53   : > { %2552 = shalt.err (!%p2549_p5)
}
  0x54   : > { %2250 = dma.hbm_to_vmem [thread:$0]  (!%p2927_p7), %s643_s18, 256, %s645_s16, %s633_s19, %s3180_s15, %s3180_s15, %s3179_s14  }
  0x55   : > { %s3191_s8 = sld [smem:[#allocation32_spill]]  ;;  %s657_s12 = scalar_lea.vmem [#allocation6], %s2910_s30 }
  0x56   : > { %s664_s20 = sshll.u32 %s657_s12, 4  ;;  %s655_s1 = scalar_lea.sflag [#allocation7], %s654_s23  ;;  %s665_s20 = int_to_ptr.vmem [resolvable:$true] %s664_s20 }
  0x5b   : > { %s660_s25 = scalar_lea.hbm %s3191_s8, %s2684_s24  ;;  %s2575_s18 = scalar_lea.hbm %s3191_s8, 2 }
  0x5c   : > { %s662_s4 = sshll.u32 %s660_s25, 4  ;;  %s663_s4 = int_to_ptr.hbm [resolvable:$true] %s662_s4 }
  0x5d   : > { %s2568_s0 = sshra.s32 %s663_s4, 4  ;;  %s2569_s0 = int_to_ptr.hbm [resolvable:$true] %s2568_s0 }
  0x5e   : > { %s2570_s21 = scalar_lea.hbm %s2569_s0, 1  ;;  %p2576_p13 = scmp.lt.s32.totalorder %s2569_s0, %s3191_s8 }
  0x5f   : > { %p2571_p5 = scmp.ne.s32.totalorder %s2569_s0, %s2570_s21  ;;  %p2577_p11 = scmp.lt.s32.totalorder %s2575_s18, %s2570_s21 }
  0x61   : > { %p2573_p8 = pnand %p2571_p5, %p2542_p9  ;;  %p2578_p0 = por %p2577_p11, %p2576_p13 }
  0x63   : > { %p2574_p10 = pneg %p2573_p8 }
  0x65   : > { %p2579_p2 = pnand %p2578_p0, %p2574_p10 }
  0x67   : > { %2582 = shalt.err (!%p2579_p2)
}
  0x68   : > { %2253 = dma.hbm_to_vmem [thread:$0]  (!%p2927_p7), %s663_s4, 16, %s665_s20, %s655_s1  }
  0x69   : > { %673 = sbr.rel (%p2833_p3) target bundleno = 1703 (0x6a7), region = 100  ;;  %s2968_s23 = sand.u32 (!%p2833_p3), 1, %s2676_s22  }
  0x6a   : > { %s1890_s19 = sshll.u32 (!%p2833_p3), %s2968_s23, 4  ;;  %s676_s30 = scalar_lea.sflag (!%p2833_p3), [#allocation4], %s2968_s23 }
  0x6b   : > { %s2974_s12 = scalar_lea.vmem (!%p2833_p3), [#allocation3], %s1890_s19 }
  0x6e   : > { %2643 = dma.done.wait (%p2903_p12), %s676_s30, 256  }
  0x6f   : > { %2645 = vsyncadd (%p2903_p12), %s676_s30, 4294967040  ;;  %s685_s28 = sand.u32 1, %s2828_s27   ;;  %s688_s29 = scalar_lea.vmem [#allocation6], %s2968_s23 }
  0x70   : > { %s686_s17 = scalar_lea.sflag [#allocation7], %s685_s28 }
  0x71   : > { %2647 = dma.done.wait (%p2903_p12), %s686_s17, 16  }
  0x72   : > { %2649 = vsyncadd (%p2903_p12), %s686_s17, 4294967280 }
  0x73   : > { %2651 = dma.done.wait (%p63_p1), [#allocation7], 3072  }
  0x74   : > { %2653 = vsyncadd (%p63_p1), [#allocation7], 4294964224 }
  0x75   : > { %2655 = dma.done.wait (%p63_p1), [#allocation10], 144  }
  0x76   : > { %2657 = vsyncadd (%p63_p1), [#allocation10], 4294967152 }
  0x77   : > { %2659 = dma.done.wait (%p63_p1), [#allocation13], 3072  }
  0x78   : > { %2661 = vsyncadd (%p63_p1), [#allocation13], 4294964224 }
  0x79   : > { %2663 = dma.done.wait (%p63_p1), [#allocation16], 1024  }
  0x7a   : > { %2665 = vsyncadd (%p63_p1), [#allocation16], 4294966272  ;;  %v2147_v0 = vld [vmem:[#allocation8 + $0x78] sm:$0xff]  ;;  %v2146_v3 = vld [vmem:[#allocation8 + $0x70] sm:$0xff]  ;;  %vm885_vm0 = vsmask.f32 4352 }
  0x7b   : > { %v2139_v1 = vld [vmem:[#allocation8 + $0x38] sm:$0xff]  ;;  %871 = vmatpush.bf16.msra.mxu0 %v2147_v0  ;;  %v2138_v4 = vld [vmem:[#allocation8 + $0x30] sm:$0xff]  ;;  %v2145_v6 = vld [vmem:[#allocation8 + $0x68] sm:$0xff]  ;;  %vm983_vm1 = vsmask.f32 7424  ;;  %s3192_s3 = sld [smem:[#allocation34_spill]] }
  0x7c   : > { %v2155_v2 = vld [vmem:[#allocation8 + $0xb8] sm:$0xff]  ;;  %952 = vmatpush.bf16.msra.mxu1 %v2139_v1  ;;  %v2154_v5 = vld [vmem:[#allocation8 + $0xb0] sm:$0xff]  ;;  %v2137_v7 = vld [vmem:[#allocation8 + $0x28] sm:$0xff]  ;;  %s3193_s26 = sld [smem:[#allocation38_spill]]  ;;  %s2188_s14 = sshll.u32 %s2828_s27, 4 }
  0x7d   : > { %1045 = vmatpush.bf16.msra.mxu2 %v2155_v2  ;;  %v2153_v8 = vld [vmem:[#allocation8 + $0xa8] sm:$0xff]  ;;  %v2144_v9 = vld [vmem:[#allocation8 + $0x60] sm:$0xff]  ;;  %v2143_v16 = vld [vmem:[#allocation8 + $0x58] sm:$0xff]  ;;  %s3194_s20 = sld [smem:[#allocation39_spill]]  ;;  %s779_s30 = scalar_lea.vmem [#allocation17], %s1890_s19 }
  0x7e   : > { %v2190_v10 = vld [vmem:[%s2974_s12] sm:$0xff]   ;;  %v2197_v11 = vld [vmem:[%s2974_s12 + $0x8] sm:$0xff]   ;;  %s3195_s0 = sld [smem:[#allocation41_spill]]  ;;  %s1725_s2 = sshll.u32 %s779_s30, 4  ;;  %s1726_s2 = int_to_ptr.vmem [resolvable:$true] %s1725_s2 }
  0x7f   : > { %872 = vmatpush.bf16.msra.mxu0 %v2146_v3  ;;  %v2136_v12 = vld [vmem:[#allocation8 + $0x20] sm:$0xff]  ;;  %v2195_v13 = vunpack.c.l.bf16 %v2197_v11  ;;  %v2192_v15 = vunpack.c.h.bf16 %v2190_v10  ;;  %v2135_v17 = vld [vmem:[#allocation8 + $0x18] sm:$0xff]  ;;  %v2196_v21 = vunpack.c.h.bf16 %v2197_v11  ;;  %v2142_v22 = vld [vmem:[#allocation8 + $0x50] sm:$0xff]  ;;  %v887_v24 = vshrl.u32 %v2190_v10, 16  ;;  %s3196_s18 = sld [smem:[#allocation43_spill]] }
  0x80   : > { %953 = vmatpush.bf16.msra.mxu1 %v2138_v4  ;;  %v2152_v14 = vld [vmem:[#allocation8 + $0xa0] sm:$0xff]  ;;  %v2151_v19 = vld [vmem:[#allocation8 + $0x98] sm:$0xff]  ;;  %v2134_v23 = vld [vmem:[#allocation8 + $0x10] sm:$0xff]  ;;  %v890_v25 = vshll.u32 %v2190_v10, 16  ;;  %s3198_s17 = sld [smem:[#allocation44_spill]] }
  0x81   : > { %1046 = vmatpush.bf16.msra.mxu2 %v2154_v5  ;;  %v789_v18 = vpack.c.bf16 %v2195_v13, %v2195_v13  ;;  %v806_v20 = vpack.c.bf16 %v2195_v13, %v2192_v15  ;;  %v2150_v28 = vld [vmem:[#allocation8 + $0x90] sm:$0xff]  ;;  %v966_v29 = vpack.c.bf16 %v2196_v21, %v2196_v21  ;;  %v2141_v31 = vld [vmem:[#allocation8 + $0x48] sm:$0xff]  ;;  %v889_v33 = vrot.slane %v887_v24, 3  ;;  %v2140_v41 = vld [vmem:[#allocation8 + $0x40] sm:$0xff] }
  0x82   : > { %v2133_v32 = vld [vmem:[#allocation8 + $0x8] sm:$0xff]  ;;  %v892_v34 = vrot.slane %v890_v25, 4  ;;  %v2132_v42 = vld [vmem:[#allocation8] sm:$0xff]  ;;  %v2317_v53 = vld [vmem:[%s3192_s3] ss:$0 sm:$0xff]  ;;  %s1713_s3 = scalar_lea.sflag [#allocation5], %s2968_s23 }
  0x83   : > { %873 = vmatpush.bf16.msra.mxu0 %v2145_v6  ;;  %v895_v26 = vshrl.u32 %v789_v18, 16  ;;  %v898_v27 = vshll.u32 %v789_v18, 16  ;;  %v987_v30 = vshll.u32 %v806_v20, 16  ;;  %v2149_v37 = vld [vmem:[#allocation8 + $0x88] sm:$0xff]  ;;  %v985_v38 = vshrl.u32 %v806_v20, 16  ;;  %v2148_v45 = vld [vmem:[#allocation8 + $0x80] sm:$0xff] }
  0x84   : > { %954 = vmatpush.bf16.msra.mxu1 %v2137_v7  ;;  %v992_v40 = vshll.u32 %v966_v29, 16  ;;  %v893_v43 = vor.u32 %v892_v34, %v889_v33 }
  0x85   : > { %1047 = vmatpush.bf16.msra.mxu2 %v2153_v8  ;;  %v897_v35 = vrot.slane %v895_v26, 3  ;;  %v900_v36 = vrot.slane %v898_v27, 4  ;;  %v989_v39 = vrot.slane %v987_v30, 1  ;;  %v2318_v27 = vld [vmem:[#allocation9] ss:$0 sm:$0xff] }
  0x86   : > { %v994_v47 = vrot.slane %v992_v40, 1  ;;  %v2319_v30 = vld [vmem:[%s3124_s5] ss:$0 sm:$0xff]  ;;  %s2618_s4 = scalar_lea.hbm %s3198_s17, 32 }
  0x87   : > { %874 = vmatpush.bf16.msra.mxu0 %v2144_v9  ;;  %v901_v44 = vor.u32 %v900_v36, %v897_v35  ;;  %v990_v46 = vor.u32 %v989_v39, %v985_v38 }
  0x88   : > { %955 = vmatpush.bf16.msra.mxu1 %v2136_v12 }
  0x89   : > { %1048 = vmatpush.bf16.msra.mxu2 %v2152_v14  ;;  %v902_v48 = vsel %vm885_vm0, %v893_v43, %v901_v44  ;;  %v995_v49 = vsel %vm983_vm1, %v990_v46, %v994_v47 }
  0x8b   : > { %875 = vmatpush.bf16.msra.mxu0 %v2143_v16 }
  0x8c   : > { %956 = vmatpush.bf16.msra.mxu1 %v2135_v17 }
  0x8d   : > { %1049 = vmatpush.bf16.msra.mxu2 %v2151_v19 }
  0x8f   : > { %876 = vmatpush.bf16.msra.mxu0 %v2142_v22 }
  0x90   : > { %957 = vmatpush.bf16.msra.mxu1 %v2134_v23 }
  0x91   : > { %1050 = vmatpush.bf16.msra.mxu2 %v2150_v28 }
  0x93   : > { %877 = vmatpush.bf16.msra.mxu0 %v2141_v31 }
  0x94   : > { %958 = vmatpush.bf16.msra.mxu1 %v2133_v32 }
  0x95   : > { %1051 = vmatpush.bf16.msra.mxu2 %v2149_v37 }
  0x97   : > { %878 = vmatpush.bf16.msra.mxu0 %v2140_v41 }
  0x98   : > { %959 = vmatpush.bf16.msra.mxu1 %v2132_v42 }
  0x99   : > { %1052 = vmatpush.bf16.msra.mxu2 %v2148_v45 }
  0x9a   : > { %879 = vmatmul.bf16.vlgmr.msra.gmra.mxu0 %v806_v20 }
  0x9b   : > { %960 = vmatmul.bf16.vlgmr.msra.gmra.mxu1 %v902_v48 }
  0x9c   : > { %1053 = vmatmul.bf16.vlgmr.msra.gmra.mxu2 %v995_v49 }
 0x117   : > { %v880_v50 = vpop.f32.mrf.mxu0 }
 0x118   : > { %v961_v51 = vpop.f32.mrf.mxu1 }
 0x119   : > { %v962_v52 = vadd.f32 %v961_v51, %v880_v50 }
 0x11f   : > { %v1054_v54 = vpop.f32.mrf.mxu2  ;;  %v882_v57 = vpop.f32.mrf.mxu0 }
 0x120   : > { %v1059_v55 = vadd.f32 %v1054_v54, %v962_v52  ;;  %v963_v58 = vpop.f32.mrf.mxu1 }
 0x121   : > { %v964_v59 = vadd.f32 %v963_v58, %v882_v57 }
 0x122   : > { %v1065_v56 = vadd.f32 %v2317_v53, %v1059_v55 }
 0x124   : > { %1069 = vadd.xlane.f32.xlu0 %v1065_v56 }
 0x127   : > { %v1056_v60 = vpop.f32.mrf.mxu2 }
 0x128   : > { %v1060_v61 = vadd.f32 %v1056_v60, %v964_v59 }
 0x12a   : > { %v1066_v62 = vadd.f32 %v2317_v53, %v1060_v61 }
 0x12c   : > { %1071 = vadd.xlane.f32.xlu0 %v1066_v62 }
 0x197   : > { %v1070_v63 = vpop.xlane.xlu0 %1069 }
 0x198   : > { %v1073_v0 = vmul.f32 0.03125, %v1070_v63 }
 0x19a   : > { %v1075_v1 = vsub.f32 %v1065_v56, %v1073_v0  ;;  %v1083_v7 = vmul.f32 %v1073_v0, %v1073_v0 }
 0x19c   : > { %v1077_v2 = vmul.f32 %v1075_v1, %v1075_v1  ;;  %v1085_v8 = vmul.f32 96.0, %v1083_v7 }
 0x19e   : > { %1079 = vadd.xlane.f32.xlu1 %v1077_v2 }
 0x19f   : > { %v1072_v3 = vpop.xlane.xlu0 %1071 }
 0x1a0   : > { %v1074_v4 = vmul.f32 0.03125, %v1072_v3 }
 0x1a2   : > { %v1076_v5 = vsub.f32 %v1066_v62, %v1074_v4  ;;  %v1084_v11 = vmul.f32 %v1074_v4, %v1074_v4 }
 0x1a4   : > { %v1078_v6 = vmul.f32 %v1076_v5, %v1076_v5  ;;  %v1086_v14 = vmul.f32 96.0, %v1084_v11 }
 0x1a6   : > { %1081 = vadd.xlane.f32.xlu1 %v1078_v6 }
 0x211   : > { %v1080_v9 = vpop.xlane.xlu1 %1079 }
 0x212   : > { %v1087_v10 = vsub.f32 %v1080_v9, %v1085_v8  ;;  %v2696_v9 = vmov 0.0  }
 0x213   : > { %1199 = vst [vmem:[#allocation2] sm:$0xff] %v2696_v9 }
 0x214   : > { %v1089_v12 = vmul.f32 0.03125, %v1087_v10  ;;  %1200 = vst [vmem:[#allocation2 + $0x18] sm:$0xff] %v2696_v9 }
 0x216   : > { %v1091_v13 = vadd.f32 1e-06, %v1089_v12 }
 0x218   : > { %2330 = vrsqrt.f32 %v1091_v13  ;;  %vm1099_vm3 = vweird.f32 %v1091_v13 }
 0x219   : > { %v1082_v15 = vpop.xlane.xlu1 %1081 }
 0x21a   : > { %v1088_v16 = vsub.f32 %v1082_v15, %v1086_v14 }
 0x21c   : > { %v1090_v17 = vmul.f32 0.03125, %v1088_v16 }
 0x21e   : > { %v2331_v18 = vpop.eup %2330  ;;  %v1092_v19 = vadd.f32 1e-06, %v1090_v17 }
 0x21f   : > { %v1094_v20 = vmul.f32 %v2331_v18, %v1091_v13  ;;  %vm1100_vm2 = vweird.f32 %v2331_v18 }
 0x220   : > { %2332 = vrsqrt.f32 %v1092_v19  ;;  %vm1101_vm4 = vmor %vm1099_vm3, %vm1100_vm2  ;;  %vm1109_vm6 = vweird.f32 %v1092_v19 }
 0x221   : > { %v1095_v21 = vmul.f32 %v2331_v18, %v1094_v20  ;;  %v2320_v20 = vld [vmem:[%s3125_s6] ss:$0 sm:$0xff] }
 0x223   : > { %v1096_v22 = vmul.f32 0.5, %v1095_v21 }
 0x225   : > { %v1097_v23 = vsub.f32 1.5, %v1096_v22  ;;  %v2321_v22 = vld [vmem:[%s3126_s7] ss:$0 sm:$0xff] }
 0x226   : > { %v2333_v24 = vpop.eup %2332 }
 0x227   : > { %v1098_v25 = vmul.f32 %v2331_v18, %v1097_v23  ;;  %v1104_v26 = vmul.f32 %v2333_v24, %v1092_v19  ;;  %vm1110_vm5 = vweird.f32 %v2333_v24 }
 0x228   : > { %vm1111_vm7 = vmor %vm1109_vm6, %vm1110_vm5 }
 0x229   : > { %v1102_v28 = vsel %vm1101_vm4, %v2331_v18, %v1098_v25  ;;  %v1105_v29 = vmul.f32 %v2333_v24, %v1104_v26 }
 0x22a   : > { %v1113_v31 = vmul.f32 %v1102_v28, %v1075_v1 }
 0x22b   : > { %v1106_v32 = vmul.f32 0.5, %v1105_v29 }
 0x22c   : > { %v1118_v33 = vmul.f32 %v2318_v27, %v1113_v31 }
 0x22d   : > { %v1107_v34 = vsub.f32 1.5, %v1106_v32 }
 0x22e   : > { %v1123_v35 = vadd.f32 %v2319_v30, %v1118_v33 }
 0x22f   : > { %v1108_v36 = vmul.f32 %v2333_v24, %v1107_v34  ;;  %v1203_v34 = vld [vmem:[#allocation11] sm:$0xff] }
 0x230   : > { %v1127_v37 = vmin.f32 %v1123_v35, 0.0  ;;  %vm1125_vm8 = vcmp.gt.f32.partialorder %v1123_v35, 0.0 }
 0x231   : > { %v1112_v38 = vsel %vm1111_vm7, %v2333_v24, %v1108_v36  ;;  %v1211_v36 = vperm.slane %v1203_v34, 1 }
 0x232   : > { %v1129_v39 = vmul.f32 1.442695, %v1127_v37  ;;  %v1114_v40 = vmul.f32 %v1112_v38, %v1076_v5  ;;  %v1218_v37 = vperm.slane %v1203_v34, 2 }
 0x234   : > { %v1119_v41 = vmul.f32 %v2318_v27, %v1114_v40  ;;  %2334 = vpow2.f32 %v1129_v39  ;;  %v2322_v27 = vld [vmem:[%s688_s29] ss:$0 sm:$0xff]  ;;  %s1724_s29 = scalar_lea.hbm %s3198_s17, %s2188_s14 }
 0x236   : > { %v1124_v42 = vadd.f32 %v2319_v30, %v1119_v41 }
 0x238   : > { %v1128_v43 = vmin.f32 %v1124_v42, 0.0  ;;  %vm1126_vm9 = vcmp.gt.f32.partialorder %v1124_v42, 0.0 }
 0x23a   : > { %v1131_v44 = vmul.f32 1.442695, %v1128_v43  ;;  %v2335_v45 = vpop.eup %2334 }
 0x23b   : > { %v1994_v46 = vadd.f32 -1.0, %v2335_v45 }
 0x23c   : > { %2336 = vpow2.f32 %v1131_v44  ;;  %v1225_v44 = vperm.slane %v1203_v34, 3 }
 0x23d   : > { %v1135_v48 = vsel %vm1125_vm8, %v1123_v35, %v1994_v46  ;;  %v1206_v35 = vperm.slane %v1203_v34, 0 }
 0x23e   : > { %v1139_v51 = vmul.f32 %v1135_v48, %v1135_v48 }
 0x242   : > { %v2337_v47 = vpop.eup %2336 }
 0x243   : > { %v1995_v49 = vadd.f32 -1.0, %v2337_v47 }
 0x245   : > { %v1136_v50 = vsel %vm1126_vm9, %v1124_v42, %v1995_v49  ;;  %v1232_v49 = vperm.slane %v1203_v34, 4 }
 0x246   : > { %v1140_v52 = vmul.f32 %v1136_v50, %v1136_v50 }
 0x248   : > { %v1141_v53 = vadd.f32 %v1140_v52, %v1139_v51 }
 0x24a   : > { %v1142_v54 = vrot.slane %v1141_v53, 4 }
 0x24c   : > { %v1143_v55 = vadd.f32 %v1142_v54, %v1141_v53 }
 0x24e   : > { %v1144_v56 = vrot.slane %v1143_v55, 2 }
 0x250   : > { %v1145_v57 = vadd.f32 %v1144_v56, %v1143_v55  ;;  %v1239_v56 = vperm.slane %v1203_v34, 5 }
 0x252   : > { %v1146_v58 = vrot.slane %v1145_v57, 1 }
 0x254   : > { %v1147_v59 = vadd.f32 %v1146_v58, %v1145_v57 }
 0x256   : > { %2338 = vrsqrt.f32 %v1147_v59  ;;  %vm1155_vm10 = vcmp.eq.f32.partialorder %v1147_v59, inf  ;;  %v1158_v3 = vand.u32 2147483648, %v1147_v59  ;;  %vm1157_vm11 = vcmp.eq.f32.partialorder %v1147_v59, 0.0 }
 0x25c   : > { %v2339_v60 = vpop.eup %2338 }
 0x25d   : > { %v1149_v61 = vmul.f32 %v2339_v60, %v1147_v59 }
 0x25f   : > { %v1150_v62 = vmul.f32 %v2339_v60, %v1149_v61 }
 0x261   : > { %v1151_v63 = vmul.f32 0.5, %v1150_v62 }
 0x263   : > { %v1152_v0 = vsub.f32 1.5, %v1151_v63  ;;  %v1246_v63 = vperm.slane %v1203_v34, 6 }
 0x265   : > { %v1153_v1 = vmul.f32 %v2339_v60, %v1152_v0 }
 0x267   : > { %v1154_v2 = vmul.f32 %v1153_v1, %v1147_v59 }
 0x269   : > { %v1156_v4 = vsel %vm1155_vm10, %v1147_v59, %v1154_v2 }
 0x26a   : > { %v1159_v5 = vsel %vm1157_vm11, %v1158_v3, %v1156_v4 }
 0x26b   : > { %1160 = vadd.xlane.f32.xlu2 %v1159_v5 }
 0x2de   : > { %v1161_v6 = vpop.xlane.xlu2 %1160 }
 0x2df   : > { %v1162_v7 = vmul.f32 0.03125, %v1161_v6 }
 0x2e1   : > { %v1163_v8 = vadd.f32 1e-06, %v1162_v7 }
 0x2e3   : > { %2340 = vrcp.f32 %v1163_v8  ;;  %v1175_v13 = vand.u32 2147483648, %v1163_v8  ;;  %v1173_v15 = vand.u32 2147483647, %v1163_v8  ;;  %vm1169_vm13 = vweird.f32 %v1163_v8 }
 0x2e5   : > { %v1176_v17 = vor.u32 1.1754944e-38, %v1175_v13  ;;  %vm1174_vm15 = vcmp.eq.f32.partialorder %v1173_v15, 8.507059e+37 }
 0x2e9   : > { %v2341_v10 = vpop.eup %2340 }
 0x2ea   : > { %v1165_v11 = vmul.f32 %v2341_v10, %v1163_v8  ;;  %vm1170_vm12 = vweird.f32 %v2341_v10 }
 0x2eb   : > { %vm1171_vm14 = vmor %vm1169_vm13, %vm1170_vm12 }
 0x2ec   : > { %v1166_v12 = vsub.f32 1.0, %v1165_v11 }
 0x2ee   : > { %v1167_v14 = vmul.f32 %v2341_v10, %v1166_v12 }
 0x2f0   : > { %v1168_v16 = vadd.f32 %v2341_v10, %v1167_v14 }
 0x2f2   : > { %v1172_v18 = vsel %vm1171_vm14, %v2341_v10, %v1168_v16  ;;  %v2323_v10 = vld [vmem:[%s3128_s9] ss:$0 sm:$0xff] }
 0x2f3   : > { %v1177_v19 = vsel %vm1174_vm15, %v1176_v17, %v1172_v18 }
 0x2f4   : > { %v1178_v21 = vmul.f32 %v1177_v19, %v1159_v5 }
 0x2f6   : > { %v1179_v23 = vmul.f32 %v1178_v21, %v1135_v48  ;;  %v1180_v24 = vmul.f32 %v1178_v21, %v1136_v50 }
 0x2f8   : > { %v1184_v25 = vmul.f32 %v2320_v20, %v1179_v23  ;;  %v1185_v26 = vmul.f32 %v2320_v20, %v1180_v24 }
 0x2fa   : > { %v1189_v28 = vadd.f32 %v2321_v22, %v1184_v25  ;;  %v1190_v29 = vadd.f32 %v2321_v22, %v1185_v26 }
 0x2fc   : > { %v1191_v30 = vadd.f32 %v1189_v28, %v1135_v48  ;;  %v1192_v31 = vadd.f32 %v1190_v29, %v1136_v50  ;;  %v2171_v28 = vld [vmem:[#allocation12 + $0x74] sm:$0xf0]  ;;  %v2170_v29 = vld [vmem:[#allocation12 + $0x74] sm:$0xf] }
 0x2fe   : > { %v3018_v32 = vadd.f32 %v2322_v27, %v1191_v30  ;;  %v3020_v33 = vadd.f32 %v2322_v27, %v1192_v31  ;;  %v2054_v27 = vld [vmem:[#allocation12 + $0x70] sm:$0xf]  ;;  %v2056_v31 = vld [vmem:[#allocation12 + $0x78] sm:$0xf0] }
 0x2ff   : > { %v2055_v30 = vor.u32 %v2171_v28, %v2054_v27  ;;  %v2059_v34 = vor.u32 %v2170_v29, %v2056_v31 }
 0x300   : > { %1201 = vst [vmem:[#allocation2 + $0x8] sm:$0xff] %v3018_v32  ;;  %v1226_v58 = vmul.f32 %v1225_v44, %v3018_v32  ;;  %v1227_v60 = vmul.f32 %v1225_v44, %v3020_v33 }
 0x301   : > { %1202 = vst [vmem:[#allocation2 + $0x10] sm:$0xff] %v3020_v33  ;;  %1418 = vmatpush.bf16.msra.mxu3 %v2055_v30  ;;  %1432 = vmatpush.bf16.msrb.mxu0 %v2059_v34 }
 0x307   : > { %v1204_v38 = vld [vmem:[#allocation2 + $0x5] sm:$0xff] }
 0x308   : > { %v1209_v39 = vld [vmem:[#allocation2 + $0x6] sm:$0xff]  ;;  %v1210_v42 = vld [vmem:[#allocation2 + $0xe] sm:$0xff]  ;;  %v1207_v45 = vmul.f32 %v1206_v35, %v1204_v38 }
 0x309   : > { %v1216_v40 = vld [vmem:[#allocation2 + $0x7] sm:$0xff]  ;;  %v1217_v43 = vld [vmem:[#allocation2 + $0xf] sm:$0xff]  ;;  %v1212_v46 = vmul.f32 %v1211_v36, %v1209_v39  ;;  %v1213_v48 = vmul.f32 %v1211_v36, %v1210_v42  ;;  %v2048_v39 = vld [vmem:[#allocation12 + $0x68] sm:$0xf0] }
 0x30a   : > { %v1205_v41 = vld [vmem:[#allocation2 + $0xd] sm:$0xff]  ;;  %v1219_v51 = vmul.f32 %v1218_v37, %v1216_v40  ;;  %v1220_v53 = vmul.f32 %v1218_v37, %v1217_v43  ;;  %v2167_v42 = vld [vmem:[#allocation12 + $0x54] sm:$0xf0]  ;;  %v2166_v43 = vld [vmem:[#allocation12 + $0x54] sm:$0xf] }
 0x30b   : > { %v1208_v47 = vmul.f32 %v1206_v35, %v1205_v41  ;;  %v1214_v50 = vadd.f32 %v1212_v46, %v1207_v45  ;;  %v1230_v54 = vld [vmem:[#allocation2 + $0x9] sm:$0xff]  ;;  %v1231_v55 = vld [vmem:[#allocation2 + $0x11] sm:$0xff]  ;;  %v2038_v41 = vld [vmem:[#allocation12 + $0x50] sm:$0xf] }
 0x30c   : > { %v1237_v61 = vld [vmem:[#allocation2 + $0xa] sm:$0xff]  ;;  %v1238_v62 = vld [vmem:[#allocation2 + $0x12] sm:$0xff]  ;;  %v1233_v1 = vmul.f32 %v1232_v49, %v1230_v54  ;;  %v1234_v3 = vmul.f32 %v1232_v49, %v1231_v55  ;;  %v2039_v44 = vor.u32 %v2167_v42, %v2038_v41  ;;  %v2163_v54 = vld [vmem:[#allocation12 + $0x34] sm:$0xf0] }
 0x30d   : > { %v1215_v52 = vadd.f32 %v1213_v48, %v1208_v47  ;;  %v1221_v57 = vadd.f32 %v1219_v51, %v1214_v50  ;;  %v1244_v4 = vld [vmem:[#allocation2 + $0xb] sm:$0xff]  ;;  %v1245_v5 = vld [vmem:[#allocation2 + $0x13] sm:$0xff]  ;;  %v1240_v7 = vmul.f32 %v1239_v56, %v1237_v61  ;;  %v1241_v9 = vmul.f32 %v1239_v56, %v1238_v62  ;;  %v2162_v55 = vld [vmem:[#allocation12 + $0x34] sm:$0xf] }
 0x30e   : > { %v1247_v12 = vmul.f32 %v1246_v63, %v1244_v4  ;;  %v1248_v14 = vmul.f32 %v1246_v63, %v1245_v5  ;;  %v2046_v35 = vld [vmem:[#allocation12 + $0x60] sm:$0xf]  ;;  %v2169_v36 = vld [vmem:[#allocation12 + $0x64] sm:$0xf0]  ;;  %v2168_v37 = vld [vmem:[#allocation12 + $0x64] sm:$0xf] }
 0x30f   : > { %v1222_v59 = vadd.f32 %v1220_v53, %v1215_v52  ;;  %v1228_v0 = vadd.f32 %v1226_v58, %v1221_v57  ;;  %v2047_v38 = vor.u32 %v2169_v36, %v2046_v35  ;;  %v2051_v40 = vor.u32 %v2168_v37, %v2048_v39  ;;  %v2040_v45 = vld [vmem:[#allocation12 + $0x58] sm:$0xf0]  ;;  %v2030_v47 = vld [vmem:[#allocation12 + $0x40] sm:$0xf]  ;;  %v2165_v48 = vld [vmem:[#allocation12 + $0x44] sm:$0xf0] }
 0x310   : > { %v2043_v46 = vor.u32 %v2166_v43, %v2040_v45  ;;  %v2164_v49 = vld [vmem:[#allocation12 + $0x44] sm:$0xf]  ;;  %v2031_v50 = vor.u32 %v2165_v48, %v2030_v47  ;;  %v2032_v51 = vld [vmem:[#allocation12 + $0x48] sm:$0xf0]  ;;  %v2022_v53 = vld [vmem:[#allocation12 + $0x30] sm:$0xf] }
 0x311   : > { %v1229_v2 = vadd.f32 %v1227_v60, %v1222_v59  ;;  %v1235_v6 = vadd.f32 %v1233_v1, %v1228_v0  ;;  %1419 = vmatpush.bf16.msra.mxu3 %v2047_v38  ;;  %1433 = vmatpush.bf16.msrb.mxu0 %v2051_v40  ;;  %v2035_v52 = vor.u32 %v2164_v49, %v2032_v51  ;;  %v2024_v57 = vld [vmem:[#allocation12 + $0x38] sm:$0xf0]  ;;  %v2014_v59 = vld [vmem:[#allocation12 + $0x20] sm:$0xf]  ;;  %v2161_v60 = vld [vmem:[#allocation12 + $0x24] sm:$0xf0] }
 0x312   : > { %v2023_v56 = vor.u32 %v2163_v54, %v2022_v53  ;;  %v2027_v58 = vor.u32 %v2162_v55, %v2024_v57  ;;  %v2160_v61 = vld [vmem:[#allocation12 + $0x24] sm:$0xf]  ;;  %v2015_v62 = vor.u32 %v2161_v60, %v2014_v59  ;;  %v2016_v63 = vld [vmem:[#allocation12 + $0x28] sm:$0xf0]  ;;  %v2006_v0 = vld [vmem:[#allocation12 + $0x10] sm:$0xf] }
 0x313   : > { %v1236_v8 = vadd.f32 %v1234_v3, %v1229_v2  ;;  %v1242_v11 = vadd.f32 %v1240_v7, %v1235_v6  ;;  %v2159_v1 = vld [vmem:[#allocation12 + $0x14] sm:$0xf0]  ;;  %v2019_v2 = vor.u32 %v2160_v61, %v2016_v63  ;;  %v2158_v3 = vld [vmem:[#allocation12 + $0x14] sm:$0xf]  ;;  %v2008_v4 = vld [vmem:[#allocation12 + $0x18] sm:$0xf0] }
 0x314   : > { %v2007_v5 = vor.u32 %v2159_v1, %v2006_v0  ;;  %v2011_v6 = vor.u32 %v2158_v3, %v2008_v4  ;;  %v1998_v7 = vld [vmem:[#allocation12] sm:$0xf]  ;;  %v2324_v41 = vld [vmem:[%s3129_s10] ss:$0 sm:$0xff] }
 0x315   : > { %v1243_v13 = vadd.f32 %v1241_v9, %v1236_v8  ;;  %v1249_v15 = vadd.f32 %v1247_v12, %v1242_v11  ;;  %1420 = vmatpush.bf16.msra.mxu3 %v2039_v44  ;;  %1434 = vmatpush.bf16.msrb.mxu0 %v2043_v46  ;;  %v2157_v8 = vld [vmem:[#allocation12 + $0x4] sm:$0xf0]  ;;  %v2000_v11 = vld [vmem:[#allocation12 + $0x8] sm:$0xf0]  ;;  %v2325_v45 = vld [vmem:[%s3130_s11] ss:$0 sm:$0xff] }
 0x317   : > { %v1250_v16 = vadd.f32 %v1248_v14, %v1243_v13  ;;  %v1255_v17 = vadd.f32 %v2323_v10, %v1249_v15  ;;  %v1999_v13 = vor.u32 %v2157_v8, %v1998_v7 }
 0x319   : > { %v1256_v18 = vadd.f32 %v2323_v10, %v1250_v16  ;;  %1259 = vadd.xlane.f32.xlu2 %v1255_v17  ;;  %1421 = vmatpush.bf16.msra.mxu3 %v2031_v50  ;;  %v2156_v10 = vld [vmem:[#allocation12 + $0x4] sm:$0xf] }
 0x31a   : > { %1435 = vmatpush.bf16.msrb.mxu0 %v2035_v52  ;;  %v2003_v14 = vor.u32 %v2156_v10, %v2000_v11  ;;  %v1332_v52 = vld [vmem:[%s3132_s13] sm:$0x3] }
 0x31b   : > { %1261 = vadd.xlane.f32.xlu0 %v1256_v18  ;;  %v1335_v53 = vperm.slane %v1332_v52, 1  ;;  %v1334_v8 = vperm.slane %v1332_v52, 0  ;;  %v2175_v52 = vld [vmem:[#allocation14 + $0x18] sm:$0xff] }
 0x31d   : > { %1422 = vmatpush.bf16.msra.mxu3 %v2023_v56 }
 0x31e   : > { %1436 = vmatpush.bf16.msrb.mxu0 %v2027_v58 }
 0x321   : > { %1423 = vmatpush.bf16.msra.mxu3 %v2015_v62 }
 0x322   : > { %1437 = vmatpush.bf16.msrb.mxu0 %v2019_v2 }
 0x325   : > { %1424 = vmatpush.bf16.msra.mxu3 %v2007_v5 }
 0x326   : > { %1438 = vmatpush.bf16.msrb.mxu0 %v2011_v6 }
 0x329   : > { %1425 = vmatpush.bf16.msra.mxu3 %v1999_v13 }
 0x32a   : > { %1439 = vmatpush.bf16.msrb.mxu0 %v2003_v14 }
 0x38c   : > { %v1260_v19 = vpop.xlane.xlu2 %1259 }
 0x38d   : > { %v3029_v21 = vmul.f32 0.03125, %v1260_v19 }
 0x38e   : > { %v1262_v20 = vpop.xlane.xlu0 %1261 }
 0x38f   : > { %v3031_v22 = vmul.f32 0.03125, %v1262_v20  ;;  %v3034_v23 = vsub.f32 %v1255_v17, %v3029_v21  ;;  %v1273_v9 = vmul.f32 %v3029_v21, %v3029_v21 }
 0x391   : > { %v3037_v24 = vsub.f32 %v1256_v18, %v3031_v22  ;;  %v1267_v25 = vmul.f32 %v3034_v23, %v3034_v23  ;;  %v1274_v12 = vmul.f32 %v3031_v22, %v3031_v22  ;;  %v1275_v15 = vmul.f32 96.0, %v1273_v9 }
 0x393   : > { %v1268_v26 = vmul.f32 %v3037_v24, %v3037_v24  ;;  %1269 = vadd.xlane.f32.xlu1 %v1267_v25  ;;  %v1276_v17 = vmul.f32 96.0, %v1274_v12 }
 0x395   : > { %1271 = vadd.xlane.f32.xlu2 %v1268_v26 }
 0x406   : > { %v1270_v16 = vpop.xlane.xlu1 %1269 }
 0x407   : > { %v1277_v18 = vsub.f32 %v1270_v16, %v1275_v15 }
 0x408   : > { %v1272_v19 = vpop.xlane.xlu2 %1271 }
 0x409   : > { %v1278_v20 = vsub.f32 %v1272_v19, %v1276_v17  ;;  %v1279_v25 = vmul.f32 0.03125, %v1277_v18 }
 0x40b   : > { %v1280_v26 = vmul.f32 0.03125, %v1278_v20  ;;  %v1281_v21 = vadd.f32 1e-06, %v1279_v25 }
 0x40d   : > { %v1282_v27 = vadd.f32 1e-06, %v1280_v26  ;;  %2342 = vrsqrt.f32 %v1281_v21  ;;  %vm1289_vm2 = vweird.f32 %v1281_v21 }
 0x40f   : > { %2344 = vrsqrt.f32 %v1282_v27  ;;  %vm1299_vm4 = vweird.f32 %v1282_v27 }
 0x413   : > { %v2343_v28 = vpop.eup %2342 }
 0x414   : > { %v1284_v29 = vmul.f32 %v2343_v28, %v1281_v21  ;;  %vm1290_vm0 = vweird.f32 %v2343_v28 }
 0x415   : > { %v2345_v22 = vpop.eup %2344  ;;  %vm1291_vm3 = vmor %vm1289_vm2, %vm1290_vm0 }
 0x416   : > { %v1294_v30 = vmul.f32 %v2345_v22, %v1282_v27  ;;  %v1285_v31 = vmul.f32 %v2343_v28, %v1284_v29  ;;  %vm1300_vm1 = vweird.f32 %v2345_v22 }
 0x417   : > { %vm1301_vm5 = vmor %vm1299_vm4, %vm1300_vm1 }
 0x418   : > { %v1295_v34 = vmul.f32 %v2345_v22, %v1294_v30  ;;  %v1286_v35 = vmul.f32 0.5, %v1285_v31 }
 0x41a   : > { %v1296_v36 = vmul.f32 0.5, %v1295_v34  ;;  %v1287_v37 = vsub.f32 1.5, %v1286_v35 }
 0x41c   : > { %v1297_v38 = vsub.f32 1.5, %v1296_v36  ;;  %v1288_v39 = vmul.f32 %v2343_v28, %v1287_v37 }
 0x41e   : > { %v1298_v40 = vmul.f32 %v2345_v22, %v1297_v38  ;;  %v1292_v42 = vsel %vm1291_vm3, %v2343_v28, %v1288_v39 }
 0x41f   : > { %v1303_v44 = vmul.f32 %v1292_v42, %v3034_v23 }
 0x420   : > { %v1302_v43 = vsel %vm1301_vm5, %v2345_v22, %v1298_v40 }
 0x421   : > { %v1304_v46 = vmul.f32 %v1302_v43, %v3037_v24  ;;  %v1308_v47 = vmul.f32 %v2324_v41, %v1303_v44 }
 0x423   : > { %v1309_v48 = vmul.f32 %v2324_v41, %v1304_v46  ;;  %v1313_v49 = vadd.f32 %v2325_v45, %v1308_v47 }
 0x425   : > { %v1314_v50 = vadd.f32 %v2325_v45, %v1309_v48  ;;  %v2179_v48 = vld [vmem:[#allocation14 + $0x38] sm:$0xff] }
 0x426   : > { %1611 = vmatpush.bf16.msrb.mxu1 %v2179_v48 }
 0x427   : > { %v1315_v51 = vpack.c.bf16 %v1314_v50, %v1313_v49  ;;  %v2178_v49 = vld [vmem:[#allocation14 + $0x30] sm:$0xff]  ;;  %v2177_v50 = vld [vmem:[#allocation14 + $0x28] sm:$0xff] }
 0x429   : > { %1426 = vmatmul.bf16.vlgmr.msra.gmra.mxu3 %v1315_v51  ;;  %1440 = vmatmul.bf16.vlgmr.msrb.gmra.mxu0 %v1315_v51  ;;  %v2176_v51 = vld [vmem:[#allocation14 + $0x20] sm:$0xff] }
 0x42a   : > { %1612 = vmatpush.bf16.msrb.mxu1 %v2178_v49 }
 0x42e   : > { %1613 = vmatpush.bf16.msrb.mxu1 %v2177_v50 }
 0x432   : > { %1614 = vmatpush.bf16.msrb.mxu1 %v2176_v51 }
 0x436   : > { %1615 = vmatpush.bf16.msrb.mxu1 %v2175_v52 }
 0x4a6   : > { %v1441_v54 = vpop.f32.mrf.mxu0 }
 0x4a7   : > { %v1442_v23 = vadd.f32 %v1441_v54, %v1335_v53  ;;  %v2173_v54 = vld [vmem:[#allocation14 + $0x8] sm:$0xff] }
 0x4a9   : > { %v2060_v55 = vmul.f32 -1.442695, %v1442_v23  ;;  %v2172_v23 = vld [vmem:[#allocation14] sm:$0xff] }
 0x4ab   : > { %2346 = vpow2.f32 %v2060_v55 }
 0x4ac   : > { %v1427_v1 = vpop.f32.mrf.mxu3 }
 0x4ad   : > { %v1428_v17 = vadd.f32 %v1427_v1, %v1334_v8 }
 0x4ae   : > { %v1443_v56 = vpop.f32.mrf.mxu0 }
 0x4af   : > { %v1444_v57 = vadd.f32 %v1443_v56, %v1335_v53  ;;  %v2174_v53 = vld [vmem:[#allocation14 + $0x10] sm:$0xff] }
 0x4b0   : > { %1616 = vmatpush.bf16.msrb.mxu1 %v2174_v53 }
 0x4b1   : > { %v2347_v58 = vpop.eup %2346  ;;  %v2061_v24 = vmul.f32 -1.442695, %v1444_v57  ;;  %v2187_v57 = vld [vmem:[#allocation15 + $0x38] sm:$0xff] }
 0x4b2   : > { %v1452_v59 = vadd.f32 1.0, %v2347_v58  ;;  %1696 = vmatpush.bf16.msrb.mxu2 %v2187_v57 }
 0x4b3   : > { %2348 = vpow2.f32 %v2061_v24  ;;  %v2186_v24 = vld [vmem:[#allocation15 + $0x30] sm:$0xff] }
 0x4b4   : > { %2350 = vrcp.f32 %v1452_v59  ;;  %v1465_v5 = vand.u32 2147483648, %v1452_v59  ;;  %vm1459_vm7 = vweird.f32 %v1452_v59  ;;  %v1463_v6 = vand.u32 2147483647, %v1452_v59  ;;  %v1429_v16 = vpop.f32.mrf.mxu3  ;;  %1617 = vmatpush.bf16.msrb.mxu1 %v2173_v54 }
 0x4b5   : > { %v1430_v25 = vadd.f32 %v1429_v16, %v1334_v8  ;;  %v2326_v8 = vld [vmem:[%s3193_s26] ss:$0 sm:$0xff]  ;;  %s1727_s26 = sshll.u32 %s1724_s29, 4  ;;  %s1728_s26 = int_to_ptr.hbm [resolvable:$true] %s1727_s26 }
 0x4b6   : > { %v1466_v11 = vor.u32 1.1754944e-38, %v1465_v5  ;;  %vm1464_vm9 = vcmp.eq.f32.partialorder %v1463_v6, 8.507059e+37  ;;  %1697 = vmatpush.bf16.msrb.mxu2 %v2186_v24  ;;  %s2612_s25 = sshra.s32 %s1728_s26, 4  ;;  %s2613_s25 = int_to_ptr.hbm [resolvable:$true] %s2612_s25 }
 0x4b7   : > { %s2614_s27 = scalar_lea.hbm %s2613_s25, 16  ;;  %p2619_p7 = scmp.lt.s32.totalorder %s2613_s25, %s3198_s17 }
 0x4b8   : > { %1618 = vmatpush.bf16.msrb.mxu1 %v2172_v23  ;;  %p2615_p1 = scmp.ne.s32.totalorder %s2613_s25, %s2614_s27  ;;  %p2620_p9 = scmp.lt.s32.totalorder %s2618_s4, %s2614_s27 }
 0x4b9   : > { %v2349_v60 = vpop.eup %2348 }
 0x4ba   : > { %v2351_v61 = vpop.eup %2350  ;;  %v1453_v62 = vadd.f32 1.0, %v2349_v60  ;;  %p2616_p3 = pnand %p2615_p1, %p2912_p4  ;;  %p2621_p5 = por %p2620_p9, %p2619_p7 }
 0x4bb   : > { %v1455_v63 = vmul.f32 %v2351_v61, %v1452_v59  ;;  %vm1460_vm6 = vweird.f32 %v2351_v61  ;;  %v2185_v59 = vld [vmem:[#allocation15 + $0x28] sm:$0xff] }
 0x4bc   : > { %2352 = vrcp.f32 %v1453_v62  ;;  %vm1461_vm8 = vmor %vm1459_vm7, %vm1460_vm6  ;;  %v1480_v12 = vand.u32 2147483648, %v1453_v62  ;;  %v1478_v14 = vand.u32 2147483647, %v1453_v62  ;;  %vm1474_vm11 = vweird.f32 %v1453_v62  ;;  %1698 = vmatpush.bf16.msrb.mxu2 %v2185_v59  ;;  %p2617_p12 = pneg %p2616_p3 }
 0x4bd   : > { %v1456_v0 = vsub.f32 1.0, %v1455_v63 }
 0x4be   : > { %v1481_v19 = vor.u32 1.1754944e-38, %v1480_v12  ;;  %vm1479_vm13 = vcmp.eq.f32.partialorder %v1478_v14, 8.507059e+37  ;;  %p2622_p8 = pnand %p2621_p5, %p2617_p12 }
 0x4bf   : > { %v1457_v2 = vmul.f32 %v2351_v61, %v1456_v0 }
 0x4c1   : > { %v1458_v3 = vadd.f32 %v2351_v61, %v1457_v2 }
 0x4c2   : > { %v2353_v4 = vpop.eup %2352 }
 0x4c3   : > { %v1470_v7 = vmul.f32 %v2353_v4, %v1453_v62  ;;  %v1462_v9 = vsel %vm1461_vm8, %v2351_v61, %v1458_v3  ;;  %vm1475_vm10 = vweird.f32 %v2353_v4  ;;  %v2184_v62 = vld [vmem:[#allocation15 + $0x20] sm:$0xff] }
 0x4c4   : > { %v1467_v15 = vsel %vm1464_vm9, %v1466_v11, %v1462_v9  ;;  %vm1476_vm12 = vmor %vm1474_vm11, %vm1475_vm10  ;;  %1699 = vmatpush.bf16.msrb.mxu2 %v2184_v62  ;;  %v2327_v11 = vld [vmem:[%s3194_s20] ss:$0 sm:$0xff] }
 0x4c5   : > { %v1471_v10 = vsub.f32 1.0, %v1470_v7  ;;  %v3058_v20 = vmul.f32 %v1467_v15, %v1428_v17 }
 0x4c7   : > { %v1472_v13 = vmul.f32 %v2353_v4, %v1471_v10  ;;  %v1488_v28 = vmul.f32 %v3058_v20, %v3058_v20 }
 0x4c9   : > { %v1473_v18 = vadd.f32 %v2353_v4, %v1472_v13 }
 0x4cb   : > { %v1477_v26 = vsel %vm1476_vm12, %v2353_v4, %v1473_v18 }
 0x4cc   : > { %v1482_v21 = vsel %vm1479_vm13, %v1481_v19, %v1477_v26  ;;  %v2183_v19 = vld [vmem:[#allocation15 + $0x18] sm:$0xff]  ;;  %v2181_v26 = vld [vmem:[#allocation15 + $0x8] sm:$0xff] }
 0x4cd   : > { %v3060_v27 = vmul.f32 %v1482_v21, %v1430_v25  ;;  %1700 = vmatpush.bf16.msrb.mxu2 %v2183_v19  ;;  %v2182_v25 = vld [vmem:[#allocation15 + $0x10] sm:$0xff]  ;;  %v2180_v21 = vld [vmem:[#allocation15] sm:$0xff] }
 0x4cf   : > { %v1489_v22 = vmul.f32 %v3060_v27, %v3060_v27 }
 0x4d1   : > { %v1490_v29 = vadd.f32 %v1489_v22, %v1488_v28  ;;  %1701 = vmatpush.bf16.msrb.mxu2 %v2182_v25  ;;  %v2328_v22 = vld [vmem:[%s3195_s0] ss:$0 sm:$0xff] }
 0x4d3   : > { %v1491_v30 = vrot.slane %v1490_v29, 4 }
 0x4d5   : > { %v1492_v31 = vadd.f32 %v1491_v30, %v1490_v29  ;;  %1702 = vmatpush.bf16.msrb.mxu2 %v2181_v26 }
 0x4d7   : > { %v1493_v34 = vrot.slane %v1492_v31, 2 }
 0x4d9   : > { %v1494_v35 = vadd.f32 %v1493_v34, %v1492_v31  ;;  %1703 = vmatpush.bf16.msrb.mxu2 %v2180_v21 }
 0x4db   : > { %v1495_v36 = vrot.slane %v1494_v35, 1 }
 0x4dd   : > { %v1496_v37 = vadd.f32 %v1495_v36, %v1494_v35  ;;  %v2329_v35 = vld [vmem:[%s3196_s18] ss:$0 sm:$0xff] }
 0x4df   : > { %2354 = vrsqrt.f32 %v1496_v37  ;;  %vm1504_vm14 = vcmp.eq.f32.partialorder %v1496_v37, inf  ;;  %v1507_v45 = vand.u32 2147483648, %v1496_v37  ;;  %vm1506_vm15 = vcmp.eq.f32.partialorder %v1496_v37, 0.0 }
 0x4e5   : > { %v2355_v38 = vpop.eup %2354 }
 0x4e6   : > { %v1498_v39 = vmul.f32 %v2355_v38, %v1496_v37 }
 0x4e8   : > { %v1499_v40 = vmul.f32 %v2355_v38, %v1498_v39 }
 0x4ea   : > { %v1500_v41 = vmul.f32 0.5, %v1499_v40 }
 0x4ec   : > { %v1501_v42 = vsub.f32 1.5, %v1500_v41 }
 0x4ee   : > { %v1502_v43 = vmul.f32 %v2355_v38, %v1501_v42 }
 0x4f0   : > { %v1503_v44 = vmul.f32 %v1502_v43, %v1496_v37 }
 0x4f2   : > { %v1505_v46 = vsel %vm1504_vm14, %v1496_v37, %v1503_v44 }
 0x4f3   : > { %v1508_v47 = vsel %vm1506_vm15, %v1507_v45, %v1505_v46 }
 0x4f4   : > { %1509 = vadd.xlane.f32.xlu0 %v1508_v47 }
 0x567   : > { %v1510_v55 = vpop.xlane.xlu0 %1509 }
 0x568   : > { %v1511_v56 = vmul.f32 0.015625, %v1510_v55 }
 0x56a   : > { %v1512_v58 = vadd.f32 1e-06, %v1511_v56 }
 0x56c   : > { %2356 = vrcp.f32 %v1512_v58  ;;  %v1524_v0 = vand.u32 2147483648, %v1512_v58  ;;  %v1522_v2 = vand.u32 2147483647, %v1512_v58  ;;  %vm1518_vm1 = vweird.f32 %v1512_v58 }
 0x56e   : > { %v1525_v4 = vor.u32 1.1754944e-38, %v1524_v0  ;;  %vm1523_vm3 = vcmp.eq.f32.partialorder %v1522_v2, 8.507059e+37 }
 0x572   : > { %v2357_v60 = vpop.eup %2356 }
 0x573   : > { %v1514_v61 = vmul.f32 %v2357_v60, %v1512_v58  ;;  %vm1519_vm0 = vweird.f32 %v2357_v60 }
 0x574   : > { %vm1520_vm2 = vmor %vm1518_vm1, %vm1519_vm0 }
 0x575   : > { %v1515_v63 = vsub.f32 1.0, %v1514_v61 }
 0x577   : > { %v1516_v1 = vmul.f32 %v2357_v60, %v1515_v63 }
 0x579   : > { %v1517_v3 = vadd.f32 %v2357_v60, %v1516_v1 }
 0x57b   : > { %v1521_v5 = vsel %vm1520_vm2, %v2357_v60, %v1517_v3 }
 0x57c   : > { %v1526_v6 = vsel %vm1523_vm3, %v1525_v4, %v1521_v5 }
 0x57d   : > { %v1527_v7 = vmul.f32 %v1526_v6, %v1508_v47 }
 0x57f   : > { %v1528_v9 = vmul.f32 %v1527_v7, %v3058_v20  ;;  %v1529_v10 = vmul.f32 %v1527_v7, %v3060_v27 }
 0x581   : > { %v1533_v12 = vmul.f32 %v2326_v8, %v1528_v9  ;;  %v1534_v13 = vmul.f32 %v2326_v8, %v1529_v10 }
 0x583   : > { %v1538_v14 = vadd.f32 %v2327_v11, %v1533_v12  ;;  %v1539_v15 = vadd.f32 %v2327_v11, %v1534_v13 }
 0x585   : > { %v1540_v16 = vadd.f32 %v1538_v14, %v3058_v20  ;;  %v1541_v17 = vadd.f32 %v1539_v15, %v3060_v27 }
 0x587   : > { %v1542_v18 = vpack.c.bf16 %v1541_v17, %v1540_v16 }
 0x589   : > { %1619 = vmatmul.bf16.vlgmr.msrb.gmra.mxu1 %v1542_v18 }
 0x606   : > { %v1620_v28 = vpop.f32.mrf.mxu1 }
 0x607   : > { %v1621_v20 = vadd.f32 %v2328_v22, %v1620_v28 }
 0x609   : > { %v1625_v30 = vadd.f32 %v1621_v20, %v3018_v32 }
 0x60e   : > { %v1622_v29 = vpop.f32.mrf.mxu1 }
 0x60f   : > { %v1623_v27 = vadd.f32 %v2328_v22, %v1622_v29 }
 0x611   : > { %v1626_v31 = vadd.f32 %v1623_v27, %v3020_v33 }
 0x613   : > { %v1627_v34 = vpack.c.bf16 %v1626_v31, %v1625_v30 }
 0x615   : > { %1704 = vmatmul.bf16.vlgmr.msrb.gmra.mxu2 %v1627_v34 }
 0x698   : > { %v1705_v36 = vpop.f32.mrf.mxu2 }
 0x699   : > { %v1706_v37 = vadd.f32 %v2329_v35, %v1705_v36 }
 0x69b   : > { %1710 = vst [vmem:[%s779_s30] sm:$0xff] %v1706_v37 }
 0x6a0   : > { %v1707_v32 = vpop.f32.mrf.mxu2 }
 0x6a1   : > { %v1708_v33 = vadd.f32 %v2329_v35, %v1707_v32 }
 0x6a3   : > { %1711 = vst [vmem:[%s779_s30 + $0x8] sm:$0xff] %v1708_v33 }
 0x6a4   : > { %2625 = shalt.err (!%p2622_p8)
}
 0x6a5   : > { %s2697_s23 = smov 128   ;;  %s2698_s21 = smov 8  }
 0x6a6   : > { %2226 = dma.vmem_to_hbm [thread:$0]  (%p2912_p4), %s1726_s2, 256, %s1728_s26, %s1713_s3, %s2697_s23, %s2697_s23, %s2698_s21  }
 0x6a7 PF: > { %s3199_s16 = sld [smem:[#allocation25_spill]]  ;;  %p3201_p10 = scmp.ge.s32.totalorder %s2684_s24, 2 }
 0x6a9   : > { %p2255_p13 = pnand %p3201_p10, %p2916_p6 }
 0x6ab   : > { %p2256_p11 = pneg %p2255_p13 }
 0x6ad   : > { %s1742_s14 = sand.u32 1, %s3199_s16  }
 0x6ae   : > { %s1743_s30 = scalar_lea.sflag [#allocation5], %s1742_s14 }
 0x6af   : > { %2667 = dma.done.wait (%p2256_p11), %s1743_s30, 256  }
 0x6b0   : > { %2669 = vsyncadd (%p2256_p11), %s1743_s30, 4294967040  ;;  %s3202_s24 = sld [smem:[#allocation27_spill]]  ;;  %s3205_s1 = smov %s2676_s22 }
 0x6b1   : > { %s3203_s12 = sld [smem:[#allocation26_spill]] }
 0x6b2   : > { %s3204_s23 = sld [smem:[#allocation28_spill]] }
 0x6b6   : > { %p39_p0 = scmp.ge.s32.totalorder %s3202_s24, 4  }
 0x6b7   : > { %s3206_s22 = smov %s3203_s12 }
 0x6b8   :  { %41 = sbr.rel (!%p39_p0) target bundleno = 25 (0x19), region = 182 }
 0x6bd   :  { %1749 = vsyncpa [#allocation4], 1 }
 0x6be   :  { %1751 = vsyncpa [#allocation4 + $0x1], 1 }
 0x6bf   :  { %1752 = vsyncpa [#allocation7], 1 }
 0x6c0   :  { %1754 = vsyncpa [#allocation7 + $0x1], 1 }
 0x6c1   :  { %1755 = vsyncpa [#allocation10], 1 }
 0x6c2   :  { %1756 = vsyncpa [#allocation13], 1 }
 0x6c3   :  { %1757 = vsyncpa [#allocation16], 1 }
 0x6c4   :  { %1758 = vsyncpa [#allocation5], 1 }
 0x6c5   :  { %1760 = vsyncpa [#allocation5 + $0x1], 1 }

</bundles_post_ra>
